<compile_context>
chip_gen: v5e
topology: v5e:2x2
jax: 0.10.0
libtpu: 0.0.40
codegen_flags: <defaults>
</compile_context>

<pallas_src>
import functools
import math

import jax
import jax.numpy as jnp
from jax.experimental import pallas as pl
from jax.experimental.pallas import tpu as pltpu


# ---------------------------------------------------------------------------
# In-kernel helpers
# ---------------------------------------------------------------------------
def _layernorm(x, w, b, eps=1e-5):
    # x: (N, D) f32, w/b: (1, D) f32 -- matches torch.nn.LayerNorm (biased var)
    mean = jnp.mean(x, axis=-1, keepdims=True)
    var = jnp.mean((x - mean) ** 2, axis=-1, keepdims=True)
    return (x - mean) * jax.lax.rsqrt(var + eps) * w + b


def _gelu_exact(x):
    return 0.5 * x * (1.0 + jax.lax.erf(x * (1.0 / math.sqrt(2.0))))


# ---------------------------------------------------------------------------
# Fused ViT kernel: patch embed (l == 0) + n_layers pre-norm attention blocks.
# grid = (n_layers,), activation carried in VMEM scratch across the grid.
# ---------------------------------------------------------------------------
def vit_kernel(patches_ref, pw_ref, pb_ref, pos_ref,
               ln1w_ref, ln1b_ref, wq_ref, wk_ref, wv_ref, wo_ref,
               ln2w_ref, ln2b_ref, w1_ref, b1_ref, w2_ref, b2_ref,
               o_ref, acc_ref, attn_ref, *, batch, seq, n_heads):
    l = pl.program_id(0)

    # ---- layer 0 only: patch embedding + positional embedding -------------
    @pl.when(l == 0)
    def _():
        y = jnp.dot(patches_ref[...], pw_ref[...],
                    preferred_element_type=jnp.float32)        # (N, D) f32
        acc_ref[...] = y + pb_ref[...] + pos_ref[...]

    x = acc_ref[...]                                            # (N, D) f32
    N, D = x.shape
    B, P, H = batch, seq, n_heads
    dh = D // H
    scale = 1.0 / math.sqrt(dh)

    # ---- self-attention (pre-norm, no mask, no bias) -----------------------
    h = _layernorm(x, ln1w_ref[0], ln1b_ref[0]).astype(jnp.bfloat16)
    q = jnp.dot(h, wq_ref[0], preferred_element_type=jnp.float32)
    k = jnp.dot(h, wk_ref[0], preferred_element_type=jnp.float32)
    v = jnp.dot(h, wv_ref[0], preferred_element_type=jnp.float32)

    # (N, D) -> (B, P, D): leading-dim split only (layout preserving).
    q3 = (q.reshape(B, P, D) * scale).astype(jnp.bfloat16)
    k3 = k.reshape(B, P, D).astype(jnp.bfloat16)
    v3 = v.reshape(B, P, D).astype(jnp.bfloat16)

    # Per-head loop (static, small H), batched over B via 3-D einsum; head
    # outputs written to VMEM scratch slices (no lane-axis concatenate).
    for hh in range(H):
        sl = slice(hh * dh, (hh + 1) * dh)
        s = jnp.einsum('bqd,bkd->bqk', q3[:, :, sl], k3[:, :, sl],
                       preferred_element_type=jnp.float32)      # (B, P, P) f32
        s = s - jnp.max(s, axis=-1, keepdims=True)
        p = jnp.exp(s)
        p = p * pl.reciprocal(jnp.sum(p, axis=-1, keepdims=True), approx=True)
        oh = jnp.einsum('bqk,bkd->bqd', p.astype(jnp.bfloat16), v3[:, :, sl],
                        preferred_element_type=jnp.float32)     # (B, P, dh)
        attn_ref[:, sl] = oh.reshape(N, dh)

    attn = jnp.dot(attn_ref[...].astype(jnp.bfloat16), wo_ref[0],
                   preferred_element_type=jnp.float32)
    x = x + attn

    # ---- MLP (hidden dim zero-padded to a lane-dense multiple of 128) -----
    h2 = _layernorm(x, ln2w_ref[0], ln2b_ref[0]).astype(jnp.bfloat16)
    m = jnp.dot(h2, w1_ref[0], preferred_element_type=jnp.float32) + b1_ref[0]
    m = _gelu_exact(m)
    # TODO(synk): dropout omitted (inference/eval semantics).
    mlp = jnp.dot(m.astype(jnp.bfloat16), w2_ref[0],
                  preferred_element_type=jnp.float32) + b2_ref[0]

    out = x + mlp
    acc_ref[...] = out                                          # carry to l+1

    @pl.when(l == pl.num_programs(0) - 1)
    def _():
        o_ref[...] = out.astype(o_ref.dtype)


# ---------------------------------------------------------------------------
# Wrapper: single pallas_call for the whole forward pass
# ---------------------------------------------------------------------------
def vision_transformer_fused(patches, pos, params, *, batch, seq, n_heads):
    N, K = patches.shape
    D = params["patch_w"].shape[1]
    L = params["wq"].shape[0]
    Dm = params["w1"].shape[2]

    def shared(shape):
        n = len(shape)
        return pl.BlockSpec(shape, lambda l, _n=n: (0,) * _n)

    def stacked(shape):
        n = len(shape)
        return pl.BlockSpec((1,) + shape, lambda l, _n=n: (l,) + (0,) * _n)

    args = (patches, params["patch_w"], params["patch_b"], pos,
            params["ln1w"], params["ln1b"], params["wq"], params["wk"],
            params["wv"], params["wo"], params["ln2w"], params["ln2b"],
            params["w1"], params["b1"], params["w2"], params["b2"])

    flops = int(2 * N * K * D
                + L * (8 * N * D * D + 4 * N * seq * D + 4 * N * D * Dm))
    transcendentals = int(L * (N * n_heads * seq + N * Dm))
    bytes_accessed = int(sum(int(a.size) * a.dtype.itemsize for a in args)
                         + N * D * 4)

    kernel = functools.partial(vit_kernel, batch=batch, seq=seq,
                               n_heads=n_heads)

    # NOTE: at larger B, add a leading "parallel" batch grid axis (megacore)
    # and keep Bt*P >= 128 per block; here the whole batch fits one block.
    out = pl.pallas_call(
        kernel,
        out_shape=jax.ShapeDtypeStruct((N, D), jnp.float32),
        grid=(L,),
        in_specs=[
            shared((N, K)),                         # patchified pixels (bf16)
            shared((K, D)),                         # patch embed weight (bf16)
            shared((1, D)),                         # patch embed bias
            shared((N, D)),                         # positional embedding
            stacked((1, D)), stacked((1, D)),       # ln1 w, b
            stacked((D, D)), stacked((D, D)),       # wq, wk
            stacked((D, D)), stacked((D, D)),       # wv, wo
            stacked((1, D)), stacked((1, D)),       # ln2 w, b
            stacked((D, Dm)), stacked((1, Dm)),     # mlp linear1 (padded)
            stacked((Dm, D)), stacked((1, D)),      # mlp linear2 (padded)
        ],
        out_specs=shared((N, D)),
        scratch_shapes=[
            pltpu.VMEM((N, D), jnp.float32),        # residual-stream carry
            pltpu.VMEM((N, D), jnp.float32),        # per-head attention output
        ],
        compiler_params=pltpu.CompilerParams(
            dimension_semantics=("arbitrary",)),
        cost_estimate=pl.CostEstimate(flops=flops,
                                      transcendentals=transcendentals,
                                      bytes_accessed=bytes_accessed),
    )(*args)
    return out


# ---------------------------------------------------------------------------
# Plain-JAX glue: patchify, positional embedding, parameter construction
# ---------------------------------------------------------------------------
def patchify(x, patch_size):
    # 'b c (w pw) (h ph) -> b (w h) (c pw ph)'
    B, C, W, H = x.shape
    wp, hp = W // patch_size, H // patch_size
    x = x.reshape(B, C, wp, patch_size, hp, patch_size)
    x = x.transpose(0, 2, 4, 1, 3, 5)
    return x.reshape(B, wp * hp, C * patch_size * patch_size)


def make_pos_embd(d, size_p, temperature=10000.0):
    assert d % 4 == 0
    wp, hp = size_p
    gw, gh = jnp.meshgrid(jnp.arange(wp, dtype=jnp.float32),
                          jnp.arange(hp, dtype=jnp.float32), indexing="ij")
    pos_d = d // 4
    omega = jnp.arange(pos_d, dtype=jnp.float32) / pos_d
    omega = 1.0 / (temperature ** omega)
    out_w = gw.flatten()[:, None] * omega[None, :]
    out_h = gh.flatten()[:, None] * omega[None, :]
    return jnp.concatenate(
        [jnp.sin(out_w), jnp.cos(out_w), jnp.sin(out_h), jnp.cos(out_h)], axis=1)


def init_params(key, d, d_mlp, n_layers, patch_size, ch=3):
    patch_dim = patch_size * patch_size * ch
    d_mlp_pad = ((d_mlp + 127) // 128) * 128          # lane-dense hidden dim
    std = 0.02
    keys = jax.random.split(key, 2 + 8 * n_layers)

    def rnd(k, shape):
        return (std * jax.random.normal(k, shape, jnp.float32))

    # nn.Linear weight is (out, in); all weights pre-transposed to (in, out).
    wq = jnp.stack([rnd(keys[2 + 8 * l + 0], (d, d)) for l in range(n_layers)])
    wk = jnp.stack([rnd(keys[2 + 8 * l + 1], (d, d)) for l in range(n_layers)])
    wv = jnp.stack([rnd(keys[2 + 8 * l + 2], (d, d)) for l in range(n_layers)])
    wo = jnp.stack([rnd(keys[2 + 8 * l + 3], (d, d)) for l in range(n_layers)])
    w1 = jnp.stack([rnd(keys[2 + 8 * l + 4], (d, d_mlp)) for l in range(n_layers)])
    b1 = jnp.stack([rnd(keys[2 + 8 * l + 5], (1, d_mlp)) for l in range(n_layers)])
    w2 = jnp.stack([rnd(keys[2 + 8 * l + 6], (d_mlp, d)) for l in range(n_layers)])
    b2 = jnp.stack([rnd(keys[2 + 8 * l + 7], (1, d)) for l in range(n_layers)])

    # Zero-pad d_mlp -> d_mlp_pad (exactly preserves the forward pass).
    pad = d_mlp_pad - d_mlp
    w1 = jnp.pad(w1, ((0, 0), (0, 0), (0, pad)))
    b1 = jnp.pad(b1, ((0, 0), (0, 0), (0, pad)))
    w2 = jnp.pad(w2, ((0, 0), (0, pad), (0, 0)))

    return {
        "patch_w": rnd(keys[0], (patch_dim, d)).astype(jnp.bfloat16),
        "patch_b": rnd(keys[1], (1, d)),
        "ln1w": jnp.ones((n_layers, 1, d), jnp.float32),
        "ln1b": jnp.zeros((n_layers, 1, d), jnp.float32),
        "wq": wq.astype(jnp.bfloat16), "wk": wk.astype(jnp.bfloat16),
        "wv": wv.astype(jnp.bfloat16), "wo": wo.astype(jnp.bfloat16),
        "ln2w": jnp.ones((n_layers, 1, d), jnp.float32),
        "ln2b": jnp.zeros((n_layers, 1, d), jnp.float32),
        "w1": w1.astype(jnp.bfloat16), "b1": b1,
        "w2": w2.astype(jnp.bfloat16), "b2": b2,
    }


def vision_transformer(x, params, pos_embd, n_heads, patch_size):
    # mask is None -> all patches (identity gather), as in the PyTorch module.
    B = x.shape[0]
    patches = patchify(x, patch_size)                           # (B, P, K)
    _, P, K = patches.shape
    D = params["patch_w"].shape[1]
    patches_flat = patches.reshape(B * P, K).astype(jnp.bfloat16)
    pos_flat = jnp.tile(pos_embd, (B, 1)).astype(jnp.float32)   # (B*P, D)
    out = vision_transformer_fused(patches_flat, pos_flat, params,
                                   batch=B, seq=P, n_heads=n_heads)
    return out.reshape(B, P, D)


# ---------------------------------------------------------------------------
if __name__ == "__main__":
    B = 2
    patch_size = 4
    size_p = (4, 4)                      # 4x4 patches -> 16x16 image
    d = 64
    n_heads = 4
    n_layers = 2
    d_mlp = int(d * 4 / 3)               # = 85, matching VisionTransformer.__init__
    W = size_p[0] * patch_size
    H = size_p[1] * patch_size

    key = jax.random.PRNGKey(0)
    k_x, k_p = jax.random.split(key)
    x = jax.random.normal(k_x, (B, 3, W, H), jnp.float32)       # NCHW, as PyTorch
    params = init_params(k_p, d, d_mlp, n_layers, patch_size)
    pos_embd = make_pos_embd(d, size_p)

    out = vision_transformer(x, params, pos_embd, n_heads, patch_size)
    out = jax.block_until_ready(out)
    assert out.shape == (B, size_p[0] * size_p[1], d)
    assert jnp.all(jnp.isfinite(out))
    print("KERNEL_OK")
</pallas_src>

<mosaic_0001>
module attributes {stable_mosaic.version = 11 : i64} {
  func.func @vit_kernel(%arg0: i32, %arg1: memref<32x48xbf16, #tpu.memory_space<vmem>>, %arg2: memref<48x64xbf16, #tpu.memory_space<vmem>>, %arg3: memref<1x64xf32, #tpu.memory_space<vmem>>, %arg4: memref<32x64xf32, #tpu.memory_space<vmem>>, %arg5: memref<1x1x64xf32, #tpu.memory_space<vmem>>, %arg6: memref<1x1x64xf32, #tpu.memory_space<vmem>>, %arg7: memref<1x64x64xbf16, #tpu.memory_space<vmem>>, %arg8: memref<1x64x64xbf16, #tpu.memory_space<vmem>>, %arg9: memref<1x64x64xbf16, #tpu.memory_space<vmem>>, %arg10: memref<1x64x64xbf16, #tpu.memory_space<vmem>>, %arg11: memref<1x1x64xf32, #tpu.memory_space<vmem>>, %arg12: memref<1x1x64xf32, #tpu.memory_space<vmem>>, %arg13: memref<1x64x128xbf16, #tpu.memory_space<vmem>>, %arg14: memref<1x1x128xf32, #tpu.memory_space<vmem>>, %arg15: memref<1x128x64xbf16, #tpu.memory_space<vmem>>, %arg16: memref<1x1x64xf32, #tpu.memory_space<vmem>>, %arg17: memref<32x64xf32, #tpu.memory_space<vmem>>, %arg18: memref<32x64xf32, #tpu.memory_space<vmem>>, %arg19: memref<32x64xf32, #tpu.memory_space<vmem>>) attributes {dimension_semantics = [#tpu.dimension_semantics<arbitrary>], iteration_bounds = array<i64: 2>, scalar_prefetch = 0 : i64, scratch_operands = 2 : i64, tpu.core_type = #tpu.core_type<tc>, window_params = [{pipeline_mode = #tpu.pipeline_mode<synchronous>, transform_indices = @transform_0, window_bounds = array<i64: 32, 48>}, {pipeline_mode = #tpu.pipeline_mode<synchronous>, transform_indices = @transform_1, window_bounds = array<i64: 48, 64>}, {pipeline_mode = #tpu.pipeline_mode<synchronous>, transform_indices = @transform_2, window_bounds = array<i64: 1, 64>}, {pipeline_mode = #tpu.pipeline_mode<synchronous>, transform_indices = @transform_3, window_bounds = array<i64: 32, 64>}, {transform_indices = @transform_4, window_bounds = array<i64: 1, 1, 64>}, {transform_indices = @transform_5, window_bounds = array<i64: 1, 1, 64>}, {transform_indices = @transform_6, window_bounds = array<i64: 1, 64, 64>}, {transform_indices = @transform_7, window_bounds = array<i64: 1, 64, 64>}, {transform_indices = @transform_8, window_bounds = array<i64: 1, 64, 64>}, {transform_indices = @transform_9, window_bounds = array<i64: 1, 64, 64>}, {transform_indices = @transform_10, window_bounds = array<i64: 1, 1, 64>}, {transform_indices = @transform_11, window_bounds = array<i64: 1, 1, 64>}, {transform_indices = @transform_12, window_bounds = array<i64: 1, 64, 128>}, {transform_indices = @transform_13, window_bounds = array<i64: 1, 1, 128>}, {transform_indices = @transform_14, window_bounds = array<i64: 1, 128, 64>}, {transform_indices = @transform_15, window_bounds = array<i64: 1, 1, 64>}, {pipeline_mode = #tpu.pipeline_mode<synchronous>, transform_indices = @transform_16, window_bounds = array<i64: 32, 64>}]} {
    %c0_i32 = arith.constant 0 : i32
    %0 = arith.cmpi eq, %arg0, %c0_i32 : i32
    %1 = arith.extui %0 : i1 to i32
    %c0_i32_0 = arith.constant 0 : i32
    %2 = arith.cmpi ne, %1, %c0_i32_0 : i32
    scf.if %2 {
      %c0_83 = arith.constant 0 : index
      %c0_84 = arith.constant 0 : index
      %181 = vector.load %arg1[%c0_83, %c0_84] : memref<32x48xbf16, #tpu.memory_space<vmem>>, vector<32x48xbf16>
      %c0_85 = arith.constant 0 : index
      %c0_86 = arith.constant 0 : index
      %182 = vector.load %arg2[%c0_85, %c0_86] : memref<48x64xbf16, #tpu.memory_space<vmem>>, vector<48x64xbf16>
      %cst_87 = arith.constant dense<0.000000e+00> : vector<32x64xf32>
      %183 = tpu.matmul %181, %182, %cst_87 {dimension_numbers = #tpu.dot_dimension_numbers<[1], [0], [0], [1], [0, 0, 1, 1], [], []>} : vector<32x48xbf16>, vector<48x64xbf16>, vector<32x64xf32> -> vector<32x64xf32>
      %c0_88 = arith.constant 0 : index
      %c0_89 = arith.constant 0 : index
      %184 = vector.load %arg3[%c0_88, %c0_89] : memref<1x64xf32, #tpu.memory_space<vmem>>, vector<1x64xf32>
      %185 = vector.broadcast %184 : vector<1x64xf32> to vector<32x64xf32>
      %186 = arith.addf %183, %185 : vector<32x64xf32>
      %c0_90 = arith.constant 0 : index
      %c0_91 = arith.constant 0 : index
      %187 = vector.load %arg4[%c0_90, %c0_91] : memref<32x64xf32, #tpu.memory_space<vmem>>, vector<32x64xf32>
      %188 = arith.addf %186, %187 : vector<32x64xf32>
      %c0_92 = arith.constant 0 : index
      %c0_93 = arith.constant 0 : index
      %189 = vector.load %arg18[%c0_92, %c0_93] : memref<32x64xf32, #tpu.memory_space<vmem>>, vector<32x64xf32>
      tpu.vector_store %arg18[%c0_92, %c0_93], %188 {strides = array<i32>} : memref<32x64xf32, #tpu.memory_space<vmem>>, vector<32x64xf32>,
    } else {
    }
    %c0 = arith.constant 0 : index
    %c0_1 = arith.constant 0 : index
    %3 = vector.load %arg18[%c0, %c0_1] : memref<32x64xf32, #tpu.memory_space<vmem>>, vector<32x64xf32>
    %c0_2 = arith.constant 0 : index
    %c0_3 = arith.constant 0 : index
    %c0_4 = arith.constant 0 : index
    %4 = vector.load %arg5[%c0_2, %c0_3, %c0_4] : memref<1x1x64xf32, #tpu.memory_space<vmem>>, vector<1x1x64xf32>
    %5 = vector.shape_cast %4 : vector<1x1x64xf32> to vector<1x64xf32>
    %c0_5 = arith.constant 0 : index
    %c0_6 = arith.constant 0 : index
    %c0_7 = arith.constant 0 : index
    %6 = vector.load %arg6[%c0_5, %c0_6, %c0_7] : memref<1x1x64xf32, #tpu.memory_space<vmem>>, vector<1x1x64xf32>
    %7 = vector.shape_cast %6 : vector<1x1x64xf32> to vector<1x64xf32>
    %cst = arith.constant dense<0.000000e+00> : vector<32xf32>
    %8 = vector.multi_reduction <add>, %3, %cst [1] : vector<32x64xf32> to vector<32xf32>
    %9 = vector.shape_cast %8 : vector<32xf32> to vector<32x1xf32>
    %cst_8 = arith.constant 6.400000e+01 : f32
    %10 = vector.broadcast %cst_8 : f32 to vector<32x1xf32>
    %11 = arith.divf %9, %10 : vector<32x1xf32>
    %12 = vector.broadcast %11 : vector<32x1xf32> to vector<32x64xf32>
    %13 = arith.subf %3, %12 : vector<32x64xf32>
    %14 = arith.mulf %13, %13 : vector<32x64xf32>
    %cst_9 = arith.constant dense<0.000000e+00> : vector<32xf32>
    %15 = vector.multi_reduction <add>, %14, %cst_9 [1] : vector<32x64xf32> to vector<32xf32>
    %16 = vector.shape_cast %15 : vector<32xf32> to vector<32x1xf32>
    %cst_10 = arith.constant 6.400000e+01 : f32
    %17 = vector.broadcast %cst_10 : f32 to vector<32x1xf32>
    %18 = arith.divf %16, %17 : vector<32x1xf32>
    %19 = vector.broadcast %11 : vector<32x1xf32> to vector<32x64xf32>
    %20 = arith.subf %3, %19 : vector<32x64xf32>
    %cst_11 = arith.constant 9.99999974E-6 : f32
    %21 = vector.broadcast %cst_11 : f32 to vector<32x1xf32>
    %22 = arith.addf %18, %21 : vector<32x1xf32>
    %23 = math.rsqrt %22 : vector<32x1xf32>
    %24 = vector.broadcast %23 : vector<32x1xf32> to vector<32x64xf32>
    %25 = arith.mulf %20, %24 : vector<32x64xf32>
    %26 = vector.broadcast %5 : vector<1x64xf32> to vector<32x64xf32>
    %27 = arith.mulf %25, %26 : vector<32x64xf32>
    %28 = vector.broadcast %7 : vector<1x64xf32> to vector<32x64xf32>
    %29 = arith.addf %27, %28 : vector<32x64xf32>
    %30 = arith.truncf %29 : vector<32x64xf32> to vector<32x64xbf16>
    %c0_12 = arith.constant 0 : index
    %c0_13 = arith.constant 0 : index
    %c0_14 = arith.constant 0 : index
    %31 = vector.load %arg7[%c0_12, %c0_13, %c0_14] : memref<1x64x64xbf16, #tpu.memory_space<vmem>>, vector<1x64x64xbf16>
    %32 = vector.shape_cast %31 : vector<1x64x64xbf16> to vector<64x64xbf16>
    %cst_15 = arith.constant dense<0.000000e+00> : vector<32x64xf32>
    %33 = tpu.matmul %30, %32, %cst_15 {dimension_numbers = #tpu.dot_dimension_numbers<[1], [0], [0], [1], [0, 0, 1, 1], [], []>} : vector<32x64xbf16>, vector<64x64xbf16>, vector<32x64xf32> -> vector<32x64xf32>
    %c0_16 = arith.constant 0 : index
    %c0_17 = arith.constant 0 : index
    %c0_18 = arith.constant 0 : index
    %34 = vector.load %arg8[%c0_16, %c0_17, %c0_18] : memref<1x64x64xbf16, #tpu.memory_space<vmem>>, vector<1x64x64xbf16>
    %35 = vector.shape_cast %34 : vector<1x64x64xbf16> to vector<64x64xbf16>
    %cst_19 = arith.constant dense<0.000000e+00> : vector<32x64xf32>
    %36 = tpu.matmul %30, %35, %cst_19 {dimension_numbers = #tpu.dot_dimension_numbers<[1], [0], [0], [1], [0, 0, 1, 1], [], []>} : vector<32x64xbf16>, vector<64x64xbf16>, vector<32x64xf32> -> vector<32x64xf32>
    %c0_20 = arith.constant 0 : index
    %c0_21 = arith.constant 0 : index
    %c0_22 = arith.constant 0 : index
    %37 = vector.load %arg9[%c0_20, %c0_21, %c0_22] : memref<1x64x64xbf16, #tpu.memory_space<vmem>>, vector<1x64x64xbf16>
    %38 = vector.shape_cast %37 : vector<1x64x64xbf16> to vector<64x64xbf16>
    %cst_23 = arith.constant dense<0.000000e+00> : vector<32x64xf32>
    %39 = tpu.matmul %30, %38, %cst_23 {dimension_numbers = #tpu.dot_dimension_numbers<[1], [0], [0], [1], [0, 0, 1, 1], [], []>} : vector<32x64xbf16>, vector<64x64xbf16>, vector<32x64xf32> -> vector<32x64xf32>
    %40 = vector.shape_cast %33 : vector<32x64xf32> to vector<2x16x64xf32>
    %cst_24 = arith.constant 2.500000e-01 : f32
    %41 = vector.broadcast %cst_24 : f32 to vector<2x16x64xf32>
    %42 = arith.mulf %40, %41 : vector<2x16x64xf32>
    %43 = arith.truncf %42 : vector<2x16x64xf32> to vector<2x16x64xbf16>
    %44 = vector.shape_cast %36 : vector<32x64xf32> to vector<2x16x64xf32>
    %45 = arith.truncf %44 : vector<2x16x64xf32> to vector<2x16x64xbf16>
    %46 = vector.shape_cast %39 : vector<32x64xf32> to vector<2x16x64xf32>
    %47 = arith.truncf %46 : vector<2x16x64xf32> to vector<2x16x64xbf16>
    %48 = vector.extract_strided_slice %43 {offsets = [0, 0, 0], sizes = [2, 16, 16], strides = [1, 1, 1]} : vector<2x16x64xbf16> to vector<2x16x16xbf16>
    %49 = vector.extract_strided_slice %45 {offsets = [0, 0, 0], sizes = [2, 16, 16], strides = [1, 1, 1]} : vector<2x16x64xbf16> to vector<2x16x16xbf16>
    "tpu.trace_start"() <{level = 10 : i32, message = "bqd,bkd->bqk"}> : () -> ()
    %cst_25 = arith.constant dense<0.000000e+00> : vector<2x16x16xf32>
    %50 = tpu.matmul %48, %49, %cst_25 {dimension_numbers = #tpu.dot_dimension_numbers<[2], [2], [1], [1], [0, 0, 0, 1, 1, 1], [0], [0]>} : vector<2x16x16xbf16>, vector<2x16x16xbf16>, vector<2x16x16xf32> -> vector<2x16x16xf32>
    "tpu.trace_stop"() : () -> ()
    %cst_26 = arith.constant dense<0xFF800000> : vector<2x16xf32>
    %51 = vector.multi_reduction <maximumf>, %50, %cst_26 [2] : vector<2x16x16xf32> to vector<2x16xf32>
    %52 = vector.shape_cast %51 : vector<2x16xf32> to vector<2x16x1xf32>
    %53 = vector.broadcast %52 : vector<2x16x1xf32> to vector<2x16x16xf32>
    %54 = arith.subf %50, %53 : vector<2x16x16xf32>
    %55 = math.exp %54 : vector<2x16x16xf32>
    %cst_27 = arith.constant dense<0.000000e+00> : vector<2x16xf32>
    %56 = vector.multi_reduction <add>, %55, %cst_27 [2] : vector<2x16x16xf32> to vector<2x16xf32>
    %57 = vector.shape_cast %56 : vector<2x16xf32> to vector<2x16x1xf32>
    %58 = tpu.reciprocal %57 {approx = true} : vector<2x16x1xf32> -> vector<2x16x1xf32>
    %59 = vector.broadcast %58 : vector<2x16x1xf32> to vector<2x16x16xf32>
    %60 = arith.mulf %55, %59 : vector<2x16x16xf32>
    %61 = arith.truncf %60 : vector<2x16x16xf32> to vector<2x16x16xbf16>
    %62 = vector.extract_strided_slice %47 {offsets = [0, 0, 0], sizes = [2, 16, 16], strides = [1, 1, 1]} : vector<2x16x64xbf16> to vector<2x16x16xbf16>
    "tpu.trace_start"() <{level = 10 : i32, message = "bqk,bkd->bqd"}> : () -> ()
    %cst_28 = arith.constant dense<0.000000e+00> : vector<2x16x16xf32>
    %63 = tpu.matmul %61, %62, %cst_28 {dimension_numbers = #tpu.dot_dimension_numbers<[2], [1], [1], [2], [0, 0, 0, 1, 1, 2], [0], [0]>} : vector<2x16x16xbf16>, vector<2x16x16xbf16>, vector<2x16x16xf32> -> vector<2x16x16xf32>
    "tpu.trace_stop"() : () -> ()
    %64 = vector.shape_cast %63 : vector<2x16x16xf32> to vector<32x16xf32>
    %c0_29 = arith.constant 0 : index
    %c0_30 = arith.constant 0 : index
    %65 = vector.load %arg19[%c0_29, %c0_30] : memref<32x64xf32, #tpu.memory_space<vmem>>, vector<32x16xf32>
    tpu.vector_store %arg19[%c0_29, %c0_30], %64 {strides = array<i32>} : memref<32x64xf32, #tpu.memory_space<vmem>>, vector<32x16xf32>,
    %66 = vector.extract_strided_slice %43 {offsets = [0, 0, 16], sizes = [2, 16, 16], strides = [1, 1, 1]} : vector<2x16x64xbf16> to vector<2x16x16xbf16>
    %67 = vector.extract_strided_slice %45 {offsets = [0, 0, 16], sizes = [2, 16, 16], strides = [1, 1, 1]} : vector<2x16x64xbf16> to vector<2x16x16xbf16>
    "tpu.trace_start"() <{level = 10 : i32, message = "bqd,bkd->bqk"}> : () -> ()
    %cst_31 = arith.constant dense<0.000000e+00> : vector<2x16x16xf32>
    %68 = tpu.matmul %66, %67, %cst_31 {dimension_numbers = #tpu.dot_dimension_numbers<[2], [2], [1], [1], [0, 0, 0, 1, 1, 1], [0], [0]>} : vector<2x16x16xbf16>, vector<2x16x16xbf16>, vector<2x16x16xf32> -> vector<2x16x16xf32>
    "tpu.trace_stop"() : () -> ()
    %cst_32 = arith.constant dense<0xFF800000> : vector<2x16xf32>
    %69 = vector.multi_reduction <maximumf>, %68, %cst_32 [2] : vector<2x16x16xf32> to vector<2x16xf32>
    %70 = vector.shape_cast %69 : vector<2x16xf32> to vector<2x16x1xf32>
    %71 = vector.broadcast %70 : vector<2x16x1xf32> to vector<2x16x16xf32>
    %72 = arith.subf %68, %71 : vector<2x16x16xf32>
    %73 = math.exp %72 : vector<2x16x16xf32>
    %cst_33 = arith.constant dense<0.000000e+00> : vector<2x16xf32>
    %74 = vector.multi_reduction <add>, %73, %cst_33 [2] : vector<2x16x16xf32> to vector<2x16xf32>
    %75 = vector.shape_cast %74 : vector<2x16xf32> to vector<2x16x1xf32>
    %76 = tpu.reciprocal %75 {approx = true} : vector<2x16x1xf32> -> vector<2x16x1xf32>
    %77 = vector.broadcast %76 : vector<2x16x1xf32> to vector<2x16x16xf32>
    %78 = arith.mulf %73, %77 : vector<2x16x16xf32>
    %79 = arith.truncf %78 : vector<2x16x16xf32> to vector<2x16x16xbf16>
    %80 = vector.extract_strided_slice %47 {offsets = [0, 0, 16], sizes = [2, 16, 16], strides = [1, 1, 1]} : vector<2x16x64xbf16> to vector<2x16x16xbf16>
    "tpu.trace_start"() <{level = 10 : i32, message = "bqk,bkd->bqd"}> : () -> ()
    %cst_34 = arith.constant dense<0.000000e+00> : vector<2x16x16xf32>
    %81 = tpu.matmul %79, %80, %cst_34 {dimension_numbers = #tpu.dot_dimension_numbers<[2], [1], [1], [2], [0, 0, 0, 1, 1, 2], [0], [0]>} : vector<2x16x16xbf16>, vector<2x16x16xbf16>, vector<2x16x16xf32> -> vector<2x16x16xf32>
    "tpu.trace_stop"() : () -> ()
    %82 = vector.shape_cast %81 : vector<2x16x16xf32> to vector<32x16xf32>
    %c0_35 = arith.constant 0 : index
    %c16 = arith.constant 16 : index
    %83 = vector.load %arg19[%c0_35, %c16] : memref<32x64xf32, #tpu.memory_space<vmem>>, vector<32x16xf32>
    tpu.vector_store %arg19[%c0_35, %c16], %82 {strides = array<i32>} : memref<32x64xf32, #tpu.memory_space<vmem>>, vector<32x16xf32>,
    %84 = vector.extract_strided_slice %43 {offsets = [0, 0, 32], sizes = [2, 16, 16], strides = [1, 1, 1]} : vector<2x16x64xbf16> to vector<2x16x16xbf16>
    %85 = vector.extract_strided_slice %45 {offsets = [0, 0, 32], sizes = [2, 16, 16], strides = [1, 1, 1]} : vector<2x16x64xbf16> to vector<2x16x16xbf16>
    "tpu.trace_start"() <{level = 10 : i32, message = "bqd,bkd->bqk"}> : () -> ()
    %cst_36 = arith.constant dense<0.000000e+00> : vector<2x16x16xf32>
    %86 = tpu.matmul %84, %85, %cst_36 {dimension_numbers = #tpu.dot_dimension_numbers<[2], [2], [1], [1], [0, 0, 0, 1, 1, 1], [0], [0]>} : vector<2x16x16xbf16>, vector<2x16x16xbf16>, vector<2x16x16xf32> -> vector<2x16x16xf32>
    "tpu.trace_stop"() : () -> ()
    %cst_37 = arith.constant dense<0xFF800000> : vector<2x16xf32>
    %87 = vector.multi_reduction <maximumf>, %86, %cst_37 [2] : vector<2x16x16xf32> to vector<2x16xf32>
    %88 = vector.shape_cast %87 : vector<2x16xf32> to vector<2x16x1xf32>
    %89 = vector.broadcast %88 : vector<2x16x1xf32> to vector<2x16x16xf32>
    %90 = arith.subf %86, %89 : vector<2x16x16xf32>
    %91 = math.exp %90 : vector<2x16x16xf32>
    %cst_38 = arith.constant dense<0.000000e+00> : vector<2x16xf32>
    %92 = vector.multi_reduction <add>, %91, %cst_38 [2] : vector<2x16x16xf32> to vector<2x16xf32>
    %93 = vector.shape_cast %92 : vector<2x16xf32> to vector<2x16x1xf32>
    %94 = tpu.reciprocal %93 {approx = true} : vector<2x16x1xf32> -> vector<2x16x1xf32>
    %95 = vector.broadcast %94 : vector<2x16x1xf32> to vector<2x16x16xf32>
    %96 = arith.mulf %91, %95 : vector<2x16x16xf32>
    %97 = arith.truncf %96 : vector<2x16x16xf32> to vector<2x16x16xbf16>
    %98 = vector.extract_strided_slice %47 {offsets = [0, 0, 32], sizes = [2, 16, 16], strides = [1, 1, 1]} : vector<2x16x64xbf16> to vector<2x16x16xbf16>
    "tpu.trace_start"() <{level = 10 : i32, message = "bqk,bkd->bqd"}> : () -> ()
    %cst_39 = arith.constant dense<0.000000e+00> : vector<2x16x16xf32>
    %99 = tpu.matmul %97, %98, %cst_39 {dimension_numbers = #tpu.dot_dimension_numbers<[2], [1], [1], [2], [0, 0, 0, 1, 1, 2], [0], [0]>} : vector<2x16x16xbf16>, vector<2x16x16xbf16>, vector<2x16x16xf32> -> vector<2x16x16xf32>
    "tpu.trace_stop"() : () -> ()
    %100 = vector.shape_cast %99 : vector<2x16x16xf32> to vector<32x16xf32>
    %c0_40 = arith.constant 0 : index
    %c32 = arith.constant 32 : index
    %101 = vector.load %arg19[%c0_40, %c32] : memref<32x64xf32, #tpu.memory_space<vmem>>, vector<32x16xf32>
    tpu.vector_store %arg19[%c0_40, %c32], %100 {strides = array<i32>} : memref<32x64xf32, #tpu.memory_space<vmem>>, vector<32x16xf32>,
    %102 = vector.extract_strided_slice %43 {offsets = [0, 0, 48], sizes = [2, 16, 16], strides = [1, 1, 1]} : vector<2x16x64xbf16> to vector<2x16x16xbf16>
    %103 = vector.extract_strided_slice %45 {offsets = [0, 0, 48], sizes = [2, 16, 16], strides = [1, 1, 1]} : vector<2x16x64xbf16> to vector<2x16x16xbf16>
    "tpu.trace_start"() <{level = 10 : i32, message = "bqd,bkd->bqk"}> : () -> ()
    %cst_41 = arith.constant dense<0.000000e+00> : vector<2x16x16xf32>
    %104 = tpu.matmul %102, %103, %cst_41 {dimension_numbers = #tpu.dot_dimension_numbers<[2], [2], [1], [1], [0, 0, 0, 1, 1, 1], [0], [0]>} : vector<2x16x16xbf16>, vector<2x16x16xbf16>, vector<2x16x16xf32> -> vector<2x16x16xf32>
    "tpu.trace_stop"() : () -> ()
    %cst_42 = arith.constant dense<0xFF800000> : vector<2x16xf32>
    %105 = vector.multi_reduction <maximumf>, %104, %cst_42 [2] : vector<2x16x16xf32> to vector<2x16xf32>
    %106 = vector.shape_cast %105 : vector<2x16xf32> to vector<2x16x1xf32>
    %107 = vector.broadcast %106 : vector<2x16x1xf32> to vector<2x16x16xf32>
    %108 = arith.subf %104, %107 : vector<2x16x16xf32>
    %109 = math.exp %108 : vector<2x16x16xf32>
    %cst_43 = arith.constant dense<0.000000e+00> : vector<2x16xf32>
    %110 = vector.multi_reduction <add>, %109, %cst_43 [2] : vector<2x16x16xf32> to vector<2x16xf32>
    %111 = vector.shape_cast %110 : vector<2x16xf32> to vector<2x16x1xf32>
    %112 = tpu.reciprocal %111 {approx = true} : vector<2x16x1xf32> -> vector<2x16x1xf32>
    %113 = vector.broadcast %112 : vector<2x16x1xf32> to vector<2x16x16xf32>
    %114 = arith.mulf %109, %113 : vector<2x16x16xf32>
    %115 = arith.truncf %114 : vector<2x16x16xf32> to vector<2x16x16xbf16>
    %116 = vector.extract_strided_slice %47 {offsets = [0, 0, 48], sizes = [2, 16, 16], strides = [1, 1, 1]} : vector<2x16x64xbf16> to vector<2x16x16xbf16>
    "tpu.trace_start"() <{level = 10 : i32, message = "bqk,bkd->bqd"}> : () -> ()
    %cst_44 = arith.constant dense<0.000000e+00> : vector<2x16x16xf32>
    %117 = tpu.matmul %115, %116, %cst_44 {dimension_numbers = #tpu.dot_dimension_numbers<[2], [1], [1], [2], [0, 0, 0, 1, 1, 2], [0], [0]>} : vector<2x16x16xbf16>, vector<2x16x16xbf16>, vector<2x16x16xf32> -> vector<2x16x16xf32>
    "tpu.trace_stop"() : () -> ()
    %118 = vector.shape_cast %117 : vector<2x16x16xf32> to vector<32x16xf32>
    %c0_45 = arith.constant 0 : index
    %c48 = arith.constant 48 : index
    %119 = vector.load %arg19[%c0_45, %c48] : memref<32x64xf32, #tpu.memory_space<vmem>>, vector<32x16xf32>
    tpu.vector_store %arg19[%c0_45, %c48], %118 {strides = array<i32>} : memref<32x64xf32, #tpu.memory_space<vmem>>, vector<32x16xf32>,
    %c0_46 = arith.constant 0 : index
    %c0_47 = arith.constant 0 : index
    %120 = vector.load %arg19[%c0_46, %c0_47] : memref<32x64xf32, #tpu.memory_space<vmem>>, vector<32x64xf32>
    %121 = arith.truncf %120 : vector<32x64xf32> to vector<32x64xbf16>
    %c0_48 = arith.constant 0 : index
    %c0_49 = arith.constant 0 : index
    %c0_50 = arith.constant 0 : index
    %122 = vector.load %arg10[%c0_48, %c0_49, %c0_50] : memref<1x64x64xbf16, #tpu.memory_space<vmem>>, vector<1x64x64xbf16>
    %123 = vector.shape_cast %122 : vector<1x64x64xbf16> to vector<64x64xbf16>
    %cst_51 = arith.constant dense<0.000000e+00> : vector<32x64xf32>
    %124 = tpu.matmul %121, %123, %cst_51 {dimension_numbers = #tpu.dot_dimension_numbers<[1], [0], [0], [1], [0, 0, 1, 1], [], []>} : vector<32x64xbf16>, vector<64x64xbf16>, vector<32x64xf32> -> vector<32x64xf32>
    %125 = arith.addf %3, %124 : vector<32x64xf32>
    %c0_52 = arith.constant 0 : index
    %c0_53 = arith.constant 0 : index
    %c0_54 = arith.constant 0 : index
    %126 = vector.load %arg11[%c0_52, %c0_53, %c0_54] : memref<1x1x64xf32, #tpu.memory_space<vmem>>, vector<1x1x64xf32>
    %127 = vector.shape_cast %126 : vector<1x1x64xf32> to vector<1x64xf32>
    %c0_55 = arith.constant 0 : index
    %c0_56 = arith.constant 0 : index
    %c0_57 = arith.constant 0 : index
    %128 = vector.load %arg12[%c0_55, %c0_56, %c0_57] : memref<1x1x64xf32, #tpu.memory_space<vmem>>, vector<1x1x64xf32>
    %129 = vector.shape_cast %128 : vector<1x1x64xf32> to vector<1x64xf32>
    %cst_58 = arith.constant dense<0.000000e+00> : vector<32xf32>
    %130 = vector.multi_reduction <add>, %125, %cst_58 [1] : vector<32x64xf32> to vector<32xf32>
    %131 = vector.shape_cast %130 : vector<32xf32> to vector<32x1xf32>
    %cst_59 = arith.constant 6.400000e+01 : f32
    %132 = vector.broadcast %cst_59 : f32 to vector<32x1xf32>
    %133 = arith.divf %131, %132 : vector<32x1xf32>
    %134 = vector.broadcast %133 : vector<32x1xf32> to vector<32x64xf32>
    %135 = arith.subf %125, %134 : vector<32x64xf32>
    %136 = arith.mulf %135, %135 : vector<32x64xf32>
    %cst_60 = arith.constant dense<0.000000e+00> : vector<32xf32>
    %137 = vector.multi_reduction <add>, %136, %cst_60 [1] : vector<32x64xf32> to vector<32xf32>
    %138 = vector.shape_cast %137 : vector<32xf32> to vector<32x1xf32>
    %cst_61 = arith.constant 6.400000e+01 : f32
    %139 = vector.broadcast %cst_61 : f32 to vector<32x1xf32>
    %140 = arith.divf %138, %139 : vector<32x1xf32>
    %141 = vector.broadcast %133 : vector<32x1xf32> to vector<32x64xf32>
    %142 = arith.subf %125, %141 : vector<32x64xf32>
    %cst_62 = arith.constant 9.99999974E-6 : f32
    %143 = vector.broadcast %cst_62 : f32 to vector<32x1xf32>
    %144 = arith.addf %140, %143 : vector<32x1xf32>
    %145 = math.rsqrt %144 : vector<32x1xf32>
    %146 = vector.broadcast %145 : vector<32x1xf32> to vector<32x64xf32>
    %147 = arith.mulf %142, %146 : vector<32x64xf32>
    %148 = vector.broadcast %127 : vector<1x64xf32> to vector<32x64xf32>
    %149 = arith.mulf %147, %148 : vector<32x64xf32>
    %150 = vector.broadcast %129 : vector<1x64xf32> to vector<32x64xf32>
    %151 = arith.addf %149, %150 : vector<32x64xf32>
    %152 = arith.truncf %151 : vector<32x64xf32> to vector<32x64xbf16>
    %c0_63 = arith.constant 0 : index
    %c0_64 = arith.constant 0 : index
    %c0_65 = arith.constant 0 : index
    %153 = vector.load %arg13[%c0_63, %c0_64, %c0_65] : memref<1x64x128xbf16, #tpu.memory_space<vmem>>, vector<1x64x128xbf16>
    %154 = vector.shape_cast %153 : vector<1x64x128xbf16> to vector<64x128xbf16>
    %cst_66 = arith.constant dense<0.000000e+00> : vector<32x128xf32>
    %155 = tpu.matmul %152, %154, %cst_66 {dimension_numbers = #tpu.dot_dimension_numbers<[1], [0], [0], [1], [0, 0, 1, 1], [], []>} : vector<32x64xbf16>, vector<64x128xbf16>, vector<32x128xf32> -> vector<32x128xf32>
    %c0_67 = arith.constant 0 : index
    %c0_68 = arith.constant 0 : index
    %c0_69 = arith.constant 0 : index
    %156 = vector.load %arg14[%c0_67, %c0_68, %c0_69] : memref<1x1x128xf32, #tpu.memory_space<vmem>>, vector<1x1x128xf32>
    %157 = vector.shape_cast %156 : vector<1x1x128xf32> to vector<1x128xf32>
    %158 = vector.broadcast %157 : vector<1x128xf32> to vector<32x128xf32>
    %159 = arith.addf %155, %158 : vector<32x128xf32>
    %cst_70 = arith.constant 5.000000e-01 : f32
    %160 = vector.broadcast %cst_70 : f32 to vector<32x128xf32>
    %161 = arith.mulf %160, %159 : vector<32x128xf32>
    %cst_71 = arith.constant 0.707106769 : f32
    %162 = vector.broadcast %cst_71 : f32 to vector<32x128xf32>
    %163 = arith.mulf %159, %162 : vector<32x128xf32>
    %164 = math.erf %163 : vector<32x128xf32>
    %cst_72 = arith.constant 1.000000e+00 : f32
    %165 = vector.broadcast %cst_72 : f32 to vector<32x128xf32>
    %166 = arith.addf %165, %164 : vector<32x128xf32>
    %167 = arith.mulf %161, %166 : vector<32x128xf32>
    %168 = arith.truncf %167 : vector<32x128xf32> to vector<32x128xbf16>
    %c0_73 = arith.constant 0 : index
    %c0_74 = arith.constant 0 : index
    %c0_75 = arith.constant 0 : index
    %169 = vector.load %arg15[%c0_73, %c0_74, %c0_75] : memref<1x128x64xbf16, #tpu.memory_space<vmem>>, vector<1x128x64xbf16>
    %170 = vector.shape_cast %169 : vector<1x128x64xbf16> to vector<128x64xbf16>
    %cst_76 = arith.constant dense<0.000000e+00> : vector<32x64xf32>
    %171 = tpu.matmul %168, %170, %cst_76 {dimension_numbers = #tpu.dot_dimension_numbers<[1], [0], [0], [1], [0, 0, 1, 1], [], []>} : vector<32x128xbf16>, vector<128x64xbf16>, vector<32x64xf32> -> vector<32x64xf32>
    %c0_77 = arith.constant 0 : index
    %c0_78 = arith.constant 0 : index
    %c0_79 = arith.constant 0 : index
    %172 = vector.load %arg16[%c0_77, %c0_78, %c0_79] : memref<1x1x64xf32, #tpu.memory_space<vmem>>, vector<1x1x64xf32>
    %173 = vector.shape_cast %172 : vector<1x1x64xf32> to vector<1x64xf32>
    %174 = vector.broadcast %173 : vector<1x64xf32> to vector<32x64xf32>
    %175 = arith.addf %171, %174 : vector<32x64xf32>
    %176 = arith.addf %125, %175 : vector<32x64xf32>
    %c0_80 = arith.constant 0 : index
    %c0_81 = arith.constant 0 : index
    %177 = vector.load %arg18[%c0_80, %c0_81] : memref<32x64xf32, #tpu.memory_space<vmem>>, vector<32x64xf32>
    tpu.vector_store %arg18[%c0_80, %c0_81], %176 {strides = array<i32>} : memref<32x64xf32, #tpu.memory_space<vmem>>, vector<32x64xf32>,
    %c1_i32 = arith.constant 1 : i32
    %178 = arith.cmpi eq, %arg0, %c1_i32 : i32
    %179 = arith.extui %178 : i1 to i32
    %c0_i32_82 = arith.constant 0 : i32
    %180 = arith.cmpi ne, %179, %c0_i32_82 : i32
    scf.if %180 {
      %c0_83 = arith.constant 0 : index
      %c0_84 = arith.constant 0 : index
      %181 = vector.load %arg17[%c0_83, %c0_84] : memref<32x64xf32, #tpu.memory_space<vmem>>, vector<32x64xf32>
      tpu.vector_store %arg17[%c0_83, %c0_84], %176 {strides = array<i32>} : memref<32x64xf32, #tpu.memory_space<vmem>>, vector<32x64xf32>,
    } else {
    }
    return
  }
  func.func @transform_0(%arg0: i32) -> (i32, i32) {
    %c0_i32 = arith.constant 0 : i32
    %c0_i32_0 = arith.constant 0 : i32
    %c0_i32_1 = arith.constant 0 : i32
    return %c0_i32, %c0_i32_0 : i32, i32
  }
  func.func @transform_1(%arg0: i32) -> (i32, i32) {
    %c0_i32 = arith.constant 0 : i32
    %c0_i32_0 = arith.constant 0 : i32
    %c0_i32_1 = arith.constant 0 : i32
    return %c0_i32, %c0_i32_0 : i32, i32
  }
  func.func @transform_2(%arg0: i32) -> (i32, i32) {
    %c0_i32 = arith.constant 0 : i32
    %c0_i32_0 = arith.constant 0 : i32
    %c0_i32_1 = arith.constant 0 : i32
    return %c0_i32, %c0_i32_0 : i32, i32
  }
  func.func @transform_3(%arg0: i32) -> (i32, i32) {
    %c0_i32 = arith.constant 0 : i32
    %c0_i32_0 = arith.constant 0 : i32
    %c0_i32_1 = arith.constant 0 : i32
    return %c0_i32, %c0_i32_0 : i32, i32
  }
  func.func @transform_4(%arg0: i32) -> (i32, i32, i32) {
    %c0_i32 = arith.constant 0 : i32
    %c0_i32_0 = arith.constant 0 : i32
    %c0_i32_1 = arith.constant 0 : i32
    return %arg0, %c0_i32, %c0_i32_0 : i32, i32, i32
  }
  func.func @transform_5(%arg0: i32) -> (i32, i32, i32) {
    %c0_i32 = arith.constant 0 : i32
    %c0_i32_0 = arith.constant 0 : i32
    %c0_i32_1 = arith.constant 0 : i32
    return %arg0, %c0_i32, %c0_i32_0 : i32, i32, i32
  }
  func.func @transform_6(%arg0: i32) -> (i32, i32, i32) {
    %c0_i32 = arith.constant 0 : i32
    %c0_i32_0 = arith.constant 0 : i32
    %c0_i32_1 = arith.constant 0 : i32
    return %arg0, %c0_i32, %c0_i32_0 : i32, i32, i32
  }
  func.func @transform_7(%arg0: i32) -> (i32, i32, i32) {
    %c0_i32 = arith.constant 0 : i32
    %c0_i32_0 = arith.constant 0 : i32
    %c0_i32_1 = arith.constant 0 : i32
    return %arg0, %c0_i32, %c0_i32_0 : i32, i32, i32
  }
  func.func @transform_8(%arg0: i32) -> (i32, i32, i32) {
    %c0_i32 = arith.constant 0 : i32
    %c0_i32_0 = arith.constant 0 : i32
    %c0_i32_1 = arith.constant 0 : i32
    return %arg0, %c0_i32, %c0_i32_0 : i32, i32, i32
  }
  func.func @transform_9(%arg0: i32) -> (i32, i32, i32) {
    %c0_i32 = arith.constant 0 : i32
    %c0_i32_0 = arith.constant 0 : i32
    %c0_i32_1 = arith.constant 0 : i32
    return %arg0, %c0_i32, %c0_i32_0 : i32, i32, i32
  }
  func.func @transform_10(%arg0: i32) -> (i32, i32, i32) {
    %c0_i32 = arith.constant 0 : i32
    %c0_i32_0 = arith.constant 0 : i32
    %c0_i32_1 = arith.constant 0 : i32
    return %arg0, %c0_i32, %c0_i32_0 : i32, i32, i32
  }
  func.func @transform_11(%arg0: i32) -> (i32, i32, i32) {
    %c0_i32 = arith.constant 0 : i32
    %c0_i32_0 = arith.constant 0 : i32
    %c0_i32_1 = arith.constant 0 : i32
    return %arg0, %c0_i32, %c0_i32_0 : i32, i32, i32
  }
  func.func @transform_12(%arg0: i32) -> (i32, i32, i32) {
    %c0_i32 = arith.constant 0 : i32
    %c0_i32_0 = arith.constant 0 : i32
    %c0_i32_1 = arith.constant 0 : i32
    return %arg0, %c0_i32, %c0_i32_0 : i32, i32, i32
  }
  func.func @transform_13(%arg0: i32) -> (i32, i32, i32) {
    %c0_i32 = arith.constant 0 : i32
    %c0_i32_0 = arith.constant 0 : i32
    %c0_i32_1 = arith.constant 0 : i32
    return %arg0, %c0_i32, %c0_i32_0 : i32, i32, i32
  }
  func.func @transform_14(%arg0: i32) -> (i32, i32, i32) {
    %c0_i32 = arith.constant 0 : i32
    %c0_i32_0 = arith.constant 0 : i32
    %c0_i32_1 = arith.constant 0 : i32
    return %arg0, %c0_i32, %c0_i32_0 : i32, i32, i32
  }
  func.func @transform_15(%arg0: i32) -> (i32, i32, i32) {
    %c0_i32 = arith.constant 0 : i32
    %c0_i32_0 = arith.constant 0 : i32
    %c0_i32_1 = arith.constant 0 : i32
    return %arg0, %c0_i32, %c0_i32_0 : i32, i32, i32
  }
  func.func @transform_16(%arg0: i32) -> (i32, i32) {
    %c0_i32 = arith.constant 0 : i32
    %c0_i32_0 = arith.constant 0 : i32
    %c0_i32_1 = arith.constant 0 : i32
    return %c0_i32, %c0_i32_0 : i32, i32
  }
}

</mosaic_0001>

<bundles_post_ra>
// kernel: tpu_custom_call.1
= control target key start
LH: loop header
LB: loop body
LE: loop exit
PB: predicated region body
PF: predicated region fallthrough
CT: control target
= control target key end

     0   :  { %s4111_s0 = inlined_call_operand.hbm [shape: bf16[32,48], index: 0, kind: input, shape index: {}]   ;;  %s4112_s1 = inlined_call_operand.hbm [shape: bf16[48,64], index: 1, kind: input, shape index: {}]   ;;  %s4113_s2 = inlined_call_operand.hbm [shape: f32[1,64], index: 2, kind: input, shape index: {}]   ;;  %s4114_s3 = inlined_call_operand.hbm [shape: f32[32,64], index: 3, kind: input, shape index: {}]   ;;  %s4115_s4 = inlined_call_operand.vmem [shape: f32[2,1,64], index: 4, kind: input, shape index: {}]   ;;  %s4116_s5 = inlined_call_operand.hbm [shape: f32[2,1,64], index: 5, kind: input, shape index: {}]   ;;  %s4117_s6 = inlined_call_operand.vmem [shape: bf16[2,64,64], index: 6, kind: input, shape index: {}]   ;;  %s4118_s7 = inlined_call_operand.vmem [shape: bf16[2,64,64], index: 7, kind: input, shape index: {}]   ;;  %s4119_s8 = inlined_call_operand.vmem [shape: bf16[2,64,64], index: 8, kind: input, shape index: {}]   ;;  %s4120_s9 = inlined_call_operand.hbm [shape: bf16[2,64,64], index: 9, kind: input, shape index: {}]   ;;  %s4121_s10 = inlined_call_operand.vmem [shape: f32[2,1,64], index: 10, kind: input, shape index: {}]   ;;  %s4122_s11 = inlined_call_operand.vmem [shape: f32[2,1,64], index: 11, kind: input, shape index: {}]   ;;  %s4123_s12 = inlined_call_operand.hbm [shape: bf16[2,64,128], index: 12, kind: input, shape index: {}]   ;;  %s4124_s13 = inlined_call_operand.vmem [shape: f32[2,1,128], index: 13, kind: input, shape index: {}]   ;;  %s4125_s14 = inlined_call_operand.vmem [shape: bf16[2,128,64], index: 14, kind: input, shape index: {}]   ;;  %s4126_s15 = inlined_call_operand.vmem [shape: f32[2,1,64], index: 15, kind: input, shape index: {}]   ;;  %s4127_s16 = inlined_call_operand.hbm [shape: f32[32,64], index: 16, kind: output, shape index: {}]  }
   0x1   :  { %4135 = sst [smem:[#allocation24_spill]] %s4111_s0 }
   0x2   :  { %4136 = sst [smem:[#allocation25_spill]] %s4112_s1 }
   0x3   :  { %4137 = sst [smem:[#allocation26_spill]] %s4113_s2 }
   0x4   :  { %4138 = sst [smem:[#allocation27_spill]] %s4114_s3 }
   0x5   :  { %4139 = sst [smem:[#allocation28_spill]] %s4116_s5 }
   0x6   :  { %4140 = sst [smem:[#allocation29_spill]] %s4117_s6 }
   0x7   :  { %4141 = sst [smem:[#allocation30_spill]] %s4118_s7 }
   0x8   :  { %4142 = sst [smem:[#allocation31_spill]] %s4119_s8 }
   0x9   :  { %4143 = sst [smem:[#allocation32_spill]] %s4120_s9 }
   0xa   :  { %4144 = sst [smem:[#allocation33_spill]] %s4121_s10 }
   0xb   :  { %4145 = sst [smem:[#allocation34_spill]] %s4122_s11 }
   0xc   :  { %4146 = sst [smem:[#allocation35_spill]] %s4123_s12 }
   0xd   :  { %4147 = sst [smem:[#allocation36_spill]] %s4124_s13 }
   0xe   :  { %4148 = sst [smem:[#allocation37_spill]] %s4125_s14 }
   0xf   :  { %4149 = sst [smem:[#allocation38_spill]] %s4126_s15 }
  0x10   :  { %4150 = sst [smem:[#allocation39_spill]] %s4127_s16 }
  0x11   :  { %21 = vsyncpa [#allocation5], 0 }
  0x12   :  { %22 = vsyncpa [#allocation8], 0 }
  0x13   :  { %23 = vsyncpa [#allocation11], 0 }
  0x14   :  { %24 = vsyncpa [#allocation6], 0  ;;  %s3449_s21 = smov 0   ;;  %s3451_s22 = smov 0  }
  0x15   :  { %s3453_s23 = smov 0   ;;  %s3455_s24 = smov 0  }
  0x16 LB: > { %4151 = sst [smem:[#allocation21_spill]] %s3340_s23  ;;  %s3468_s25 = sadd.s32 4294967295, %s3344_s24   ;;  %s3344_s24 = sphi %s3455_s24, %s4188_s24   ;;  %s3340_s23 = sphi %s3453_s23, %s4185_s23   ;;  %s3336_s22 = sphi %s3451_s22, %s4187_s22   ;;  %s3332_s21 = sphi %s3449_s21, %s4186_s21  }
  0x17   : > { %p160_p0 = scmp.ne.s32.totalorder %s3336_s22, %s3332_s21  ;;  %p161_p1 = scmp.eq.s32.totalorder %s3468_s25, 0 }
  0x18   : > { %p2606_p2 = scmp.ge.s32.totalorder %s3344_s24, 1  ;;  %p452_p3 = scmp.lt.s32.totalorder %s3344_s24, 3 }
  0x19   : > { %p2607_p4 = scmp.ne.s32.totalorder %s3468_s25, 0  ;;  %p3477_p5 = por %p161_p1, %p160_p0 }
  0x1a   : > { %s4153_s29 = sld [smem:[#allocation24_spill]]  ;;  %p3484_p6 = pnand %p2606_p2, %p452_p3 }
  0x1b   : > { %s3346_s17 = smov [#allocation4]   ;;  %s3497_s20 = sadd.s32 1, %s3344_s24  }
  0x1c   : > { %p2871_p7 = pneg %p3484_p6  ;;  %s465_s18 = sshll.u32 %s3346_s17, 4  ;;  %s466_s18 = int_to_ptr.vmem [resolvable:$true] %s465_s18 }
  0x1d   : > { %s4128_s21 = smov 64   ;;  %s4130_s27 = smov 4  }
  0x1e   : > { %p3492_p8 = pnand %p2871_p7, %p161_p1  ;;  %s144_s28 = ssub.s32 %s3344_s24, %s3497_s20 }
  0x1f   : > { %p145_p9 = scmp.eq.s32.totalorder %s144_s28, 0  ;;  %p154_p10 = scmp.ne.s32.totalorder %s3340_s23, %s3336_s22 }
  0x20   : > { %s463_s30 = sshll.u32 %s4153_s29, 4  ;;  %s147_s29 = sadd.s32 1, %s3340_s23  ;;  %s464_s30 = int_to_ptr.hbm [resolvable:$true] %s463_s30 }
  0x21   : > { %2874 = dma.hbm_to_vmem [thread:$0]  (!%p3492_p8), %s464_s30, 256, %s466_s18, [#allocation5], %s4128_s21, %s4128_s21, %s4130_s27  }
  0x22   : > { %p155_p11 = scmp.eq.s32.totalorder %s3344_s24, 0  ;;  %p2898_p12 = scmp.lt.s32.totalorder %s3344_s24, 2 }
  0x23   : > { %s3512_s17 = scalar_select %p145_p9, %s3340_s23, %s147_s29  }
  0x24   : > { %p156_p13 = por %p155_p11, %p154_p10  ;;  %s525_s16 = sand.u32 1, %s3344_s24  }
  0x25   : > { %4156 = sst [smem:[#allocation22_spill]] %s3512_s17  ;;  %s527_s14 = sand.u32 1, %s3340_s23  }
  0x26   : > { %s4157_s5 = sld [smem:[#allocation28_spill]]  ;;  %s528_s8 = scalar_lea.vmem [#allocation12], %s527_s14 }
  0x27   : > { %s535_s7 = sshll.u32 %s528_s8, 4  ;;  %p3520_p0 = pnand %p2898_p12, %p156_p13  ;;  %s536_s7 = int_to_ptr.vmem [resolvable:$true] %s535_s7 }
  0x28   : > { %s2612_s18 = sshll.u32 %s527_s14, 5  ;;  %s3526_s21 = scalar_lea.sflag [#allocation5], %s525_s16 }
  0x29   : > { %s570_s28 = scalar_lea.vmem [#allocation13], %s2612_s18  ;;  %p3090_p3 = pneg %p3520_p0 }
  0x2a   : > { %s3524_s29 = sshll.u32 %s570_s28, 4 }
  0x2b   : > { %4159 = sst [smem:[#allocation23_spill]] %s3524_s29 }
  0x2c   : > { %s531_s11 = scalar_lea.hbm %s4157_s5, %s3344_s24  ;;  %s3093_s15 = scalar_lea.hbm %s4157_s5, 2 }
  0x2d   : > { %s533_s10 = sshll.u32 %s531_s11, 4  ;;  %s534_s10 = int_to_ptr.hbm [resolvable:$true] %s533_s10 }
  0x2e   : > { %s3086_s27 = sshra.s32 %s534_s10, 4  ;;  %s3087_s27 = int_to_ptr.hbm [resolvable:$true] %s3086_s27 }
  0x2f   : > { %s3088_s13 = scalar_lea.hbm %s3087_s27, 1  ;;  %p3094_p10 = scmp.lt.s32.totalorder %s3087_s27, %s4157_s5 }
  0x30   : > { %p3089_p2 = scmp.ne.s32.totalorder %s3087_s27, %s3088_s13  ;;  %p3095_p11 = scmp.lt.s32.totalorder %s3093_s15, %s3088_s13 }
  0x32   : > { %p3091_p7 = pnand %p3090_p3, %p3089_p2  ;;  %p3096_p12 = por %p3095_p11, %p3094_p10 }
  0x34   : > { %p3092_p9 = pneg %p3091_p7 }
  0x36   : > { %p3097_p13 = pnand %p3096_p12, %p3092_p9 }
  0x38   : > { %3100 = shalt.err (!%p3097_p13)
}
  0x39   : > { %2887 = dma.hbm_to_vmem [thread:$0]  (!%p3520_p0), %s534_s10, 16, %s536_s7, %s3526_s21  }
  0x3a   : > { %s604_s16 = scalar_lea.vmem [#allocation14], %s2612_s18  ;;  %s4160_s1 = sld [smem:[#allocation25_spill]] }
  0x3b   : > { %s3543_s28 = sshll.u32 %s604_s16, 4  ;;  %s3349_s17 = smov [#allocation7]   ;;  %s613_s28 = int_to_ptr.vmem [resolvable:$true] %s3543_s28 }
  0x3c   : > { %s479_s13 = sshll.u32 %s3349_s17, 4  ;;  %s4134_s15 = sshll.u32 %s3344_s24, 5  ;;  %s480_s13 = int_to_ptr.vmem [resolvable:$true] %s479_s13 }
  0x3d   : > { %s4161_s9 = sld [smem:[#allocation32_spill]]  ;;  %s4162_s7 = smov 4  }
  0x3e   : > { %s4163_s10 = smov 64   ;;  %s4164_s2 = sld [smem:[#allocation26_spill]] }
  0x40   : > { %s477_s27 = sshll.u32 %s4160_s1, 4  ;;  %s478_s27 = int_to_ptr.hbm [resolvable:$true] %s477_s27 }
  0x41   : > { %2877 = dma.hbm_to_vmem [thread:$0]  (!%p3492_p8), %s478_s27, 384, %s480_s13, [#allocation8], %s4163_s10, %s4163_s10, %s4162_s7  }
  0x43   : > { %s575_s23 = scalar_lea.hbm %s4161_s9, %s4134_s15  ;;  %s3153_s15 = scalar_lea.hbm %s4161_s9, 64 }
  0x44   : > { %s576_s18 = sshll.u32 %s575_s23, 4  ;;  %s492_s11 = sshll.u32 %s4164_s2, 4  ;;  %s577_s18 = int_to_ptr.hbm [resolvable:$true] %s576_s18  ;;  %s493_s11 = int_to_ptr.hbm [resolvable:$true] %s492_s11 }
  0x45   : > { %s3146_s17 = sshra.s32 %s577_s18, 4  ;;  %s3147_s17 = int_to_ptr.hbm [resolvable:$true] %s3146_s17 }
  0x46   : > { %s3148_s29 = scalar_lea.hbm %s3147_s17, 32  ;;  %p3154_p10 = scmp.lt.s32.totalorder %s3147_s17, %s4161_s9 }
  0x47   : > { %p3149_p2 = scmp.ne.s32.totalorder %s3147_s17, %s3148_s29  ;;  %p3155_p11 = scmp.lt.s32.totalorder %s3153_s15, %s3148_s29 }
  0x49   : > { %p3151_p7 = pnand %p3149_p2, %p3090_p3  ;;  %p3156_p12 = por %p3155_p11, %p3154_p10 }
  0x4b   : > { %p3152_p9 = pneg %p3151_p7 }
  0x4d   : > { %p3157_p13 = pnand %p3156_p12, %p3152_p9 }
  0x4f   : > { %3160 = shalt.err (!%p3157_p13)
}
  0x50   : > { %s4165_s13 = sld [smem:[#allocation23_spill]]  ;;  %s3350_s15 = smov [#allocation9]  }
  0x51   : > { %s4167_s3 = sld [smem:[#allocation27_spill]]  ;;  %s494_s17 = sshll.u32 %s3350_s15, 4  ;;  %s495_s17 = int_to_ptr.vmem [resolvable:$true] %s494_s17 }
  0x52   : > { %2880 = dma.hbm_to_vmem [thread:$0]  (!%p3492_p8), %s493_s11, 16, %s495_s17, [#allocation8]  }
  0x53   : > { %s3351_s14 = smov [#allocation10]   ;;  %s3352_s23 = smov 128  }
  0x54   : > { %s505_s27 = sshll.u32 %s3351_s14, 4  ;;  %s4169_s12 = sld [smem:[#allocation35_spill]]  ;;  %s506_s27 = int_to_ptr.vmem [resolvable:$true] %s505_s27 }
  0x56   : > { %s4166_s16 = int_to_ptr.vmem [resolvable:$true] %s4165_s13  ;;  %s3353_s13 = smov 8  }
  0x57   : > { %2890 = dma.hbm_to_vmem [thread:$0]  (!%p3520_p0), %s577_s18, 512, %s4166_s16, %s3526_s21, %s4163_s10, %s4163_s10, %s4162_s7  }
  0x58   : > { %s503_s29 = sshll.u32 %s4167_s3, 4  ;;  %s4168_s18 = sshll.u32 %s3344_s24, 5  ;;  %s504_s29 = int_to_ptr.hbm [resolvable:$true] %s503_s29 }
  0x59   : > { %2883 = dma.hbm_to_vmem [thread:$0]  (!%p3492_p8), %s504_s29, 512, %s506_s27, [#allocation11], %s3352_s23, %s3352_s23, %s3353_s13  }
  0x5a   : > { %s609_s8 = scalar_lea.hbm %s4169_s12, %s4168_s18  ;;  %s3243_s19 = scalar_lea.hbm %s4169_s12, 64 }
  0x5b   : > { %s610_s5 = sshll.u32 %s609_s8, 4  ;;  %s611_s5 = int_to_ptr.hbm [resolvable:$true] %s610_s5 }
  0x5c   : > { %s3236_s15 = sshra.s32 %s611_s5, 4  ;;  %s3237_s15 = int_to_ptr.hbm [resolvable:$true] %s3236_s15 }
  0x5d   : > { %s3238_s2 = scalar_lea.hbm %s3237_s15, 32  ;;  %p3244_p8 = scmp.lt.s32.totalorder %s3237_s15, %s4169_s12 }
  0x5e   : > { %p3239_p2 = scmp.ne.s32.totalorder %s3237_s15, %s3238_s2  ;;  %p3245_p10 = scmp.lt.s32.totalorder %s3243_s19, %s3238_s2 }
  0x60   : > { %p3241_p7 = pnand %p3239_p2, %p3090_p3  ;;  %p3246_p11 = por %p3245_p10, %p3244_p8 }
  0x62   : > { %p3242_p9 = pneg %p3241_p7 }
  0x64   : > { %p3247_p12 = pnand %p3246_p11, %p3242_p9 }
  0x66   : > { %3250 = shalt.err (!%p3247_p12)
}
  0x67   : > { %2893 = dma.hbm_to_vmem [thread:$0]  (!%p3520_p0), %s611_s5, 512, %s613_s28, %s3526_s21, %s4163_s10, %s4163_s10, %s4162_s7  }
  0x68   : > { %644 = sbr.rel (%p3484_p6) target bundleno = 2341 (0x925), region = 84 }
  0x6d   : > { %3311 = dma.done.wait (%p161_p1), [#allocation5], 256  }
  0x6e   : > { %3313 = vsyncadd (%p161_p1), [#allocation5], 4294967040 }
  0x6f   : > { %3315 = dma.done.wait (%p161_p1), [#allocation8], 400  }
  0x70   : > { %3317 = vsyncadd (%p161_p1), [#allocation8], 4294966896 }
  0x71   : > { %3319 = dma.done.wait (%p161_p1), [#allocation11], 512  }
  0x72   : > { %3321 = vsyncadd (%p161_p1), [#allocation11], 4294966784  ;;  %s666_s1 = sand.u32 1, %s3468_s25   ;;  %s668_s2 = sand.u32 1, %s3336_s22  }
  0x73   : > { %s667_s0 = scalar_lea.sflag [#allocation5], %s666_s1  ;;  %s3623_s21 = scalar_lea.vmem [#allocation12], %s668_s2 }
  0x74   : > { %3323 = dma.done.wait (%p3477_p5), %s667_s0, 1040  }
  0x75   : > { %3325 = vsyncadd (%p3477_p5), %s667_s0, 4294966256  ;;  %s2623_s30 = sshll.u32 %s668_s2, 5  ;;  %p778_p6 = scmp.lt.s32.totalorder %s3468_s25, 1 }
  0x76   : > { %s4170_s6 = sld [smem:[#allocation29_spill]]  ;;  %s3675_s29 = scalar_lea.vmem [#allocation13], %s2623_s30 }
  0x77   : > { %s3631_s28 = scalar_select %p778_p6, %s3468_s25, 1 }
  0x78   : > { %s4171_s8 = sld [smem:[#allocation30_spill]]  ;;  %s3677_s24 = scalar_lea.vmem [#allocation14], %s2623_s30 }
  0x79   : > { %s2805_s27 = sshll.u32 %s3631_s28, 5  ;;  %s4172_s17 = sld [smem:[#allocation31_spill]] }
  0x7a   : > { %s4173_s1 = sld [smem:[#allocation33_spill]]  ;;  %s2808_s18 = sshll.u32 %s3631_s28, 6 }
  0x7b   : > { %s4174_s10 = sld [smem:[#allocation34_spill]] }
  0x7c   : > { %s3641_s13 = scalar_lea.vmem %s4170_s6, %s2805_s27  ;;  %s4175_s3 = sld [smem:[#allocation36_spill]] }
  0x7d   : > { %s4176_s9 = sld [smem:[#allocation38_spill]] }
  0x7e   : > { %s3646_s5 = scalar_lea.vmem %s4171_s8, %s2805_s27  ;;  %s4177_s11 = sld [smem:[#allocation37_spill]] }
  0x7f   : > { %s3651_s19 = scalar_lea.vmem %s4172_s17, %s2805_s27 }
  0x80   : > { %s798_s2 = scalar_lea.vmem %s4173_s1, %s3631_s28  ;;  %817 = sbr.rel (%p2607_p4) target bundleno = 285 (0x11d), region = 116 }
  0x81   : > { %s801_s26 = scalar_lea.vmem %s4174_s10, %s3631_s28 }
  0x82   : > { %s804_s6 = scalar_lea.vmem %s4175_s3, %s3631_s28 }
  0x83   : > { %s812_s12 = scalar_lea.vmem %s4176_s9, %s3631_s28 }
  0x84   : > { %s3673_s17 = scalar_lea.vmem %s4177_s11, %s2808_s18 }
  0x85   : > { %v2813_v0 = vld [vmem:[#allocation7 + $0x10] sm:$0xff]  ;;  %v2812_v1 = vld [vmem:[#allocation7 + $0x8] sm:$0xff]  ;;  %v2811_v2 = vld [vmem:[#allocation7] sm:$0xff]  ;;  %vm860_vm0 = vcmask 392192   ;;  %vm894_vm1 = vcmask 523264  }
  0x86   : > { %872 = vmatpush.bf16.msra.mxu0 %v2813_v0  ;;  %2842 = vmatpush.bf16.msra.mxu1 %v2813_v0  ;;  %v2809_v3 = vld [vmem:[#allocation4] sm:$0xff]  ;;  %v2810_v4 = vld [vmem:[#allocation4 + $0x8] sm:$0xff]  ;;  %v887_v15 = vld [vmem:[#allocation10 + $0x8] sm:$0xff] }
  0x87   : > { %v2955_v5 = vld [vmem:[#allocation9] ss:$0 sm:$0xff]  ;;  %v886_v7 = vld [vmem:[#allocation10] sm:$0xff]  ;;  %v888_v9 = vld [vmem:[#allocation10 + $0x10] sm:$0xff] }
  0x88   : > { %v889_v17 = vld [vmem:[#allocation10 + $0x18] sm:$0xff] }
  0x8a   : > { %873 = vmatpush.bf16.msra.mxu0 %v2812_v1  ;;  %2843 = vmatpush.bf16.msra.mxu1 %v2812_v1 }
  0x8e   : > { %874 = vmatpush.bf16.msra.mxu0 %v2811_v2  ;;  %2844 = vmatpush.bf16.msra.mxu1 %v2811_v2 }
  0x91   : > { %2654 = vmatmul.msk.bf16.vlgmr.msra.gmra.mxu0 %vm860_vm0, %v2809_v3  ;;  %2655 = vmatmul.msk.bf16.vlgmr.msra.gmra.mxu1 %vm860_vm0, %v2810_v4 }
 0x10e   : > { %v876_v6 = vpop.f32.mrf.mxu0  ;;  %v881_v8 = vpop.f32.mrf.mxu1 }
 0x10f   : > { %v877_v10 = vadd.f32 %v2955_v5, %v876_v6  ;;  %v882_v11 = vadd.f32 %v2955_v5, %v881_v8 }
 0x111   : > { %v890_v12 = vadd.f32 %v886_v7, %v877_v10  ;;  %v892_v13 = vadd.f32 %v888_v9, %v882_v11 }
 0x113   : > { %895 = vst.msk [vmem:[#allocation2] sm:$0xff] %vm894_vm1, %v890_v12 }
 0x114   : > { %897 = vst.msk [vmem:[#allocation2 + $0x10] sm:$0xff] %vm894_vm1, %v892_v13 }
 0x116   : > { %v878_v14 = vpop.f32.mrf.mxu0  ;;  %v883_v16 = vpop.f32.mrf.mxu1 }
 0x117   : > { %v879_v18 = vadd.f32 %v2955_v5, %v878_v14  ;;  %v884_v19 = vadd.f32 %v2955_v5, %v883_v16 }
 0x119   : > { %v891_v20 = vadd.f32 %v887_v15, %v879_v18  ;;  %v893_v21 = vadd.f32 %v889_v17, %v884_v19 }
 0x11b   : > { %896 = vst.msk [vmem:[#allocation2 + $0x8] sm:$0xff] %vm894_vm1, %v891_v20 }
 0x11c   : > { %898 = vst.msk [vmem:[#allocation2 + $0x18] sm:$0xff] %vm894_vm1, %v893_v21 }
 0x11d PF: > { %v901_v22 = vld [vmem:[#allocation2 + $0x10] sm:$0xff]  ;;  %vm905_vm2 = vcmask 523264   ;;  %v899_v23 = vld [vmem:[#allocation2] sm:$0xff]  ;;  %v3354_v30 = vmov 64.0   ;;  %v2817_v57 = vld [vmem:[%s3641_s13 + $0x18] sm:$0xff]  ;;  %s4178_s30 = scalar_lea.vmem %s4115_s4, %s3631_s28  ;;  %vm1202_vm0 = vcmask 130048  }
 0x11e   : > { %v912_v24 = vsel %vm905_vm2, %v901_v22, 0.0  ;;  %v906_v25 = vsel %vm905_vm2, %v899_v23, 0.0  ;;  %2962 = vrcp.f32 %v3354_v30  ;;  %v2821_v58 = vld [vmem:[%s3646_s5 + $0x18] sm:$0xff]  ;;  %1059 = vmatpush.bf16.msra.mxu0 %v2817_v57  ;;  %v2816_v60 = vld [vmem:[%s3641_s13 + $0x10] sm:$0xff]  ;;  %v2815_v63 = vld [vmem:[%s3641_s13 + $0x8] sm:$0xff]  ;;  %s3356_s14 = smov 96  }
 0x11f   : > { %913 = vadd.xlane.f32.xlu1 %v912_v24  ;;  %907 = vadd.xlane.f32.xlu0 %v906_v25  ;;  %v2825_v59 = vld [vmem:[%s3651_s19 + $0x18] sm:$0xff]  ;;  %v2820_v61 = vld [vmem:[%s3646_s5 + $0x10] sm:$0xff]  ;;  %v2819_v0 = vld [vmem:[%s3646_s5 + $0x8] sm:$0xff]  ;;  %s3360_s1 = smov 48   ;;  %vm1523_vm1 = vcmask 261248   ;;  %p2798_p1 = scmp.ne.s32.totalorder %s3468_s25, 1 }
 0x120   : > { %1110 = vmatpush.bf16.msra.mxu1 %v2821_v58  ;;  %1161 = vmatpush.bf16.msra.mxu2 %v2825_v59  ;;  %v2824_v62 = vld [vmem:[%s3651_s19 + $0x10] sm:$0xff]  ;;  %v2823_v1 = vld [vmem:[%s3651_s19 + $0x8] sm:$0xff]  ;;  %v2814_v5 = vld [vmem:[%s3641_s13] sm:$0xff]  ;;  %s3357_s13 = smov 80  }
 0x121   : > { %v2818_v6 = vld [vmem:[%s3646_s5] sm:$0xff]  ;;  %s3358_s5 = smov 16  }
 0x122   : > { %v900_v27 = vld [vmem:[#allocation2 + $0x8] sm:$0xff]  ;;  %1060 = vmatpush.bf16.msra.mxu0 %v2816_v60  ;;  %v2822_v7 = vld [vmem:[%s3651_s19] sm:$0xff]  ;;  %s3359_s19 = smov 32  }
 0x123   : > { %v902_v26 = vld [vmem:[#allocation2 + $0x18] sm:$0xff]  ;;  %v909_v29 = vsel %vm905_vm2, %v900_v27, 0.0 }
 0x124   : > { %v915_v28 = vsel %vm905_vm2, %v902_v26, 0.0  ;;  %v2963_v31 = vpop.eup %2962  ;;  %1111 = vmatpush.bf16.msra.mxu1 %v2820_v61  ;;  %1162 = vmatpush.bf16.msra.mxu2 %v2824_v62 }
 0x125   : > { %v919_v32 = vmul.f32 64.0, %v2963_v31  ;;  %vm923_vm3 = vweird.f32 %v2963_v31 }
 0x126   : > { %1061 = vmatpush.bf16.msra.mxu0 %v2815_v63 }
 0x127   : > { %916 = vadd.xlane.f32.xlu1 %v915_v28  ;;  %910 = vadd.xlane.f32.xlu0 %v909_v29  ;;  %v920_v33 = vsub.f32 1.0, %v919_v32 }
 0x128   : > { %1112 = vmatpush.bf16.msra.mxu1 %v2819_v0  ;;  %1163 = vmatpush.bf16.msra.mxu2 %v2823_v1 }
 0x129   : > { %v921_v34 = vmul.f32 %v2963_v31, %v920_v33 }
 0x12a   : > { %1062 = vmatpush.bf16.msra.mxu0 %v2814_v5 }
 0x12b   : > { %v922_v35 = vadd.f32 %v2963_v31, %v921_v34 }
 0x12c   : > { %1113 = vmatpush.bf16.msra.mxu1 %v2818_v6  ;;  %1164 = vmatpush.bf16.msra.mxu2 %v2822_v7 }
 0x12d   : > { %v3685_v36 = vsel %vm923_vm3, %v2963_v31, %v922_v35  ;;  %vm1690_vm3 = vcmask 392448  }
 0x192   : > { %v914_v37 = vpop.xlane.xlu1 %913  ;;  %v908_v38 = vpop.xlane.xlu0 %907 }
 0x193   : > { %v927_v39 = vmul.f32 %v3685_v36, %v914_v37  ;;  %v925_v40 = vmul.f32 %v3685_v36, %v908_v38  ;;  %v2956_v38 = vld [vmem:[%s4178_s30] ss:$0 sm:$0xff] }
 0x195   : > { %v3689_v41 = vsub.f32 %v901_v22, %v927_v39  ;;  %v3691_v42 = vsub.f32 %v899_v23, %v925_v40 }
 0x197   : > { %v935_v43 = vmul.f32 %v3689_v41, %v3689_v41  ;;  %v933_v44 = vmul.f32 %v3691_v42, %v3691_v42 }
 0x199   : > { %v943_v45 = vsel %vm905_vm2, %v935_v43, 0.0  ;;  %v937_v46 = vsel %vm905_vm2, %v933_v44, 0.0 }
 0x19a   : > { %v917_v47 = vpop.xlane.xlu1 %916  ;;  %944 = vadd.xlane.f32.xlu0 %v943_v45  ;;  %938 = vadd.xlane.f32.xlu2 %v937_v46  ;;  %v911_v48 = vpop.xlane.xlu0 %910 }
 0x19b   : > { %v928_v49 = vmul.f32 %v3685_v36, %v917_v47  ;;  %v926_v50 = vmul.f32 %v3685_v36, %v911_v48  ;;  %v2957_v47 = vld [vmem:[%s3623_s21] ss:$0 sm:$0xff]  ;;  %s3355_s21 = smov 112  }
 0x19d   : > { %v3701_v51 = vsub.f32 %v902_v26, %v928_v49  ;;  %v3703_v52 = vsub.f32 %v900_v27, %v926_v50 }
 0x19f   : > { %v936_v53 = vmul.f32 %v3701_v51, %v3701_v51  ;;  %v934_v54 = vmul.f32 %v3703_v52, %v3703_v52 }
 0x1a1   : > { %v946_v55 = vsel %vm905_vm2, %v936_v53, 0.0  ;;  %v940_v56 = vsel %vm905_vm2, %v934_v54, 0.0 }
 0x1a2   : > { %947 = vadd.xlane.f32.xlu1 %v946_v55  ;;  %941 = vadd.xlane.f32.xlu2 %v940_v56 }
 0x20d   : > { %v939_v2 = vpop.xlane.xlu2 %938  ;;  %v945_v4 = vpop.xlane.xlu0 %944 }
 0x20e   : > { %v949_v3 = vmul.f32 %v939_v2, %v3685_v36  ;;  %v951_v9 = vmul.f32 %v945_v4, %v3685_v36 }
 0x210   : > { %v953_v8 = vadd.f32 1e-05, %v949_v3  ;;  %v955_v10 = vadd.f32 1e-05, %v951_v9 }
 0x212   : > { %2964 = vrsqrt.f32 %v953_v8  ;;  %vm963_vm5 = vweird.f32 %v953_v8  ;;  %vm983_vm12 = vweird.f32 %v955_v10 }
 0x213   : > { %2966 = vrsqrt.f32 %v955_v10 }
 0x215   : > { %v948_v11 = vpop.xlane.xlu1 %947  ;;  %v942_v12 = vpop.xlane.xlu2 %941 }
 0x216   : > { %v952_v13 = vmul.f32 %v948_v11, %v3685_v36  ;;  %v950_v14 = vmul.f32 %v942_v12, %v3685_v36 }
 0x218   : > { %v2965_v15 = vpop.eup %2964  ;;  %v956_v16 = vadd.f32 1e-05, %v952_v13  ;;  %v954_v17 = vadd.f32 1e-05, %v950_v14 }
 0x219   : > { %v958_v18 = vmul.f32 %v2965_v15, %v953_v8  ;;  %v2967_v21 = vpop.eup %2966  ;;  %vm964_vm4 = vweird.f32 %v2965_v15 }
 0x21a   : > { %2968 = vrsqrt.f32 %v956_v16  ;;  %v978_v27 = vmul.f32 %v2967_v21, %v955_v10  ;;  %vm965_vm6 = vmor %vm963_vm5, %vm964_vm4  ;;  %vm973_vm8 = vweird.f32 %v954_v17  ;;  %vm993_vm10 = vweird.f32 %v956_v16 }
 0x21b   : > { %v959_v19 = vmul.f32 %v2965_v15, %v958_v18  ;;  %2970 = vrsqrt.f32 %v954_v17  ;;  %vm984_vm13 = vweird.f32 %v2967_v21  ;;  %vm1857_vm4 = vcmask 523648  }
 0x21c   : > { %v979_v32 = vmul.f32 %v2967_v21, %v978_v27  ;;  %vm985_vm15 = vmor %vm983_vm12, %vm984_vm13 }
 0x21d   : > { %v960_v20 = vmul.f32 0.5, %v959_v19 }
 0x21e   : > { %v980_v39 = vmul.f32 0.5, %v979_v32 }
 0x21f   : > { %v961_v22 = vsub.f32 1.5, %v960_v20 }
 0x220   : > { %v2969_v23 = vpop.eup %2968  ;;  %v981_v48 = vsub.f32 1.5, %v980_v39 }
 0x221   : > { %v2971_v24 = vpop.eup %2970  ;;  %v988_v25 = vmul.f32 %v2969_v23, %v956_v16  ;;  %v962_v26 = vmul.f32 %v2965_v15, %v961_v22  ;;  %vm994_vm11 = vweird.f32 %v2969_v23 }
 0x222   : > { %v968_v28 = vmul.f32 %v2971_v24, %v954_v17  ;;  %vm974_vm7 = vweird.f32 %v2971_v24  ;;  %vm995_vm14 = vmor %vm993_vm10, %vm994_vm11  ;;  %v982_v54 = vmul.f32 %v2967_v21, %v981_v48 }
 0x223   : > { %v989_v29 = vmul.f32 %v2969_v23, %v988_v25  ;;  %v966_v31 = vsel %vm965_vm6, %v2965_v15, %v962_v26  ;;  %vm975_vm9 = vmor %vm973_vm8, %vm974_vm7 }
 0x224   : > { %v969_v30 = vmul.f32 %v2971_v24, %v968_v28  ;;  %v997_v37 = vmul.f32 %v966_v31, %v3691_v42 }
 0x225   : > { %v990_v34 = vmul.f32 0.5, %v989_v29 }
 0x226   : > { %v970_v33 = vmul.f32 0.5, %v969_v30  ;;  %v1004_v46 = vmul.f32 %v2956_v38, %v997_v37 }
 0x227   : > { %v991_v43 = vsub.f32 1.5, %v990_v34 }
 0x228   : > { %v971_v35 = vsub.f32 1.5, %v970_v33  ;;  %v1011_v50 = vadd.f32 %v2957_v47, %v1004_v46 }
 0x229   : > { %v992_v42 = vmul.f32 %v2969_v23, %v991_v43 }
 0x22a   : > { %v972_v40 = vmul.f32 %v2971_v24, %v971_v35 }
 0x22b   : > { %v996_v56 = vsel %vm995_vm14, %v2969_v23, %v992_v42 }
 0x22c   : > { %v976_v44 = vsel %vm975_vm9, %v2971_v24, %v972_v40  ;;  %v1000_v57 = vmul.f32 %v996_v56, %v3701_v51 }
 0x22d   : > { %v998_v45 = vmul.f32 %v976_v44, %v3703_v52  ;;  %v986_v52 = vsel %vm985_vm15, %v2967_v21, %v982_v54 }
 0x22e   : > { %v999_v58 = vmul.f32 %v986_v52, %v3689_v41  ;;  %v1007_v59 = vmul.f32 %v2956_v38, %v1000_v57 }
 0x22f   : > { %v1005_v49 = vmul.f32 %v2956_v38, %v998_v45 }
 0x230   : > { %v1006_v60 = vmul.f32 %v2956_v38, %v999_v58  ;;  %v1014_v61 = vadd.f32 %v2957_v47, %v1007_v59 }
 0x231   : > { %v1012_v53 = vadd.f32 %v2957_v47, %v1005_v49 }
 0x232   : > { %v1013_v62 = vadd.f32 %v2957_v47, %v1006_v60 }
 0x233   : > { %v1015_v55 = vpack.c.bf16 %v1012_v53, %v1011_v50 }
 0x234   : > { %v1016_v63 = vpack.c.bf16 %v1014_v61, %v1013_v62 }
 0x235   : > { %2672 = vmatmul.msk.bf16.vlgmr.msra.gmra.mxu0 %vm905_vm2, %v1015_v55  ;;  %2690 = vmatmul.msk.bf16.vlgmr.msra.gmra.mxu1 %vm905_vm2, %v1015_v55 }
 0x236   : > { %2708 = vmatmul.msk.bf16.vlgmr.msra.gmra.mxu2 %vm905_vm2, %v1015_v55 }
 0x245   : > { %2673 = vmatmul.msk.bf16.gmra.mxu0 %vm905_vm2, %v1016_v63  ;;  %2691 = vmatmul.msk.bf16.gmra.mxu1 %vm905_vm2, %v1016_v63 }
 0x246   : > { %2709 = vmatmul.msk.bf16.gmra.mxu2 %vm905_vm2, %v1016_v63 }
 0x2b2   : > { %v1064_v0 = vpop.f32.mrf.mxu0  ;;  %v1115_v1 = vpop.f32.mrf.mxu1 }
 0x2b3   : > { %v1176_v2 = vmul.f32 0.25, %v1064_v0  ;;  %v1184_v3 = vpack.c.bf16 %v1115_v1, %v1115_v1 }
 0x2b5   : > { %v1180_v6 = vpack.c.bf16 %v1176_v2, %v1176_v2  ;;  %v1199_v8 = vunpack.c.l.b16 %v1184_v3 }
 0x2b7   : > { %v1194_v11 = vunpack.c.l.b16 %v1180_v6 }
 0x2b9   : > { %v1166_v4 = vpop.f32.mrf.mxu2 }
 0x2ba   : > { %v1066_v5 = vpop.f32.mrf.mxu0  ;;  %v1117_v51 = vpop.f32.mrf.mxu1  ;;  %v1188_v25 = vpack.c.bf16 %v1166_v4, %v1166_v4 }
 0x2bb   : > { %v1177_v41 = vmul.f32 0.25, %v1066_v5  ;;  %v1185_v7 = vpack.c.bf16 %v1117_v51, %v1117_v51 }
 0x2bc   : > { %v1308_v33 = vunpack.c.l.b16 %v1188_v25 }
 0x2bd   : > { %v1181_v9 = vpack.c.bf16 %v1177_v41, %v1177_v41  ;;  %v1200_v10 = vunpack.c.l.b16 %v1185_v7 }
 0x2bf   : > { %v1195_v12 = vunpack.c.l.b16 %v1181_v9  ;;  %v1201_v13 = vpack.c.b16 %v1200_v10, %v1199_v8 }
 0x2c1   : > { %v1196_v14 = vpack.c.b16 %v1195_v12, %v1194_v11  ;;  %v1168_v15 = vpop.f32.mrf.mxu2  ;;  %1363 = vrot.lane.b32.xlu2 %v1201_v13, %s3355_s21  ;;  %v1207_v16 = vsel %vm1202_vm0, %v1201_v13, 0 }
 0x2c2   : > { %v1069_v17 = vpop.f32.mrf.mxu0  ;;  %v1120_v18 = vpop.f32.mrf.mxu1  ;;  %1216 = vmatpush.bf16.xpose.msrb.mxu0 %v1207_v16  ;;  %v1189_v20 = vpack.c.bf16 %v1168_v15, %v1168_v15 }
 0x2c3   : > { %1361 = vrot.lane.b32.xlu0 %v1196_v14, %s3355_s21  ;;  %v1178_v19 = vmul.f32 0.25, %v1069_v17  ;;  %v1186_v21 = vpack.c.bf16 %v1120_v18, %v1120_v18 }
 0x2c4   : > { %v1309_v29 = vunpack.c.l.b16 %v1189_v20 }
 0x2c5   : > { %v1182_v26 = vpack.c.bf16 %v1178_v19, %v1178_v19  ;;  %v1230_v30 = vunpack.c.l.b16 %v1186_v21 }
 0x2c6   : > { %v3748_v39 = vpack.c.b16 %v1309_v29, %v1308_v33 }
 0x2c7   : > { %v1225_v34 = vunpack.c.l.b16 %v1182_v26 }
 0x2c9   : > { %v1171_v22 = vpop.f32.mrf.mxu2  ;;  %1530 = vrot.lane.b32.xlu2 %v1201_v13, %s3356_s14  ;;  %2710 = vmatmul.msk.bf16.vlgmr.msrb.gmra.mxu0 %vm1202_vm0, %v1196_v14 }
 0x2ca   : > { %v1071_v23 = vpop.f32.mrf.mxu0  ;;  %v1122_v24 = vpop.f32.mrf.mxu1  ;;  %v1190_v38 = vpack.c.bf16 %v1171_v22, %v1171_v22 }
 0x2cb   : > { %v1179_v27 = vmul.f32 0.25, %v1071_v23  ;;  %v1187_v28 = vpack.c.bf16 %v1122_v24, %v1122_v24 }
 0x2cc   : > { %v1336_v46 = vunpack.c.l.b16 %v1190_v38 }
 0x2cd   : > { %v1183_v31 = vpack.c.bf16 %v1179_v27, %v1179_v27  ;;  %v1231_v32 = vunpack.c.l.b16 %v1187_v28 }
 0x2cf   : > { %v1226_v35 = vunpack.c.l.b16 %v1183_v31  ;;  %v1232_v37 = vpack.c.b16 %v1231_v32, %v1230_v30 }
 0x2d1   : > { %v1227_v40 = vpack.c.b16 %v1226_v35, %v1225_v34  ;;  %v1173_v43 = vpop.f32.mrf.mxu2  ;;  %1528 = vrot.lane.b32.xlu2 %v1196_v14, %s3356_s14  ;;  %1387 = vrot.lane.b32.xlu1 %v1232_v37, %s3355_s21  ;;  %v1237_v44 = vsel %vm1202_vm0, %v1232_v37, 0 }
 0x2d2   : > { %v1191_v45 = vpack.c.bf16 %v1173_v43, %v1173_v43  ;;  %1246 = vmatpush.bf16.xpose.msra.mxu3 %v1237_v44 }
 0x2d3   : > { %1385 = vrot.lane.b32.xlu0 %v1227_v40, %s3355_s21 }
 0x2d4   : > { %v1337_v47 = vunpack.c.l.b16 %v1191_v45 }
 0x2d6   : > { %v3755_v48 = vpack.c.b16 %v1337_v47, %v1336_v46 }
 0x2d8   : > { %1350 = vmatpush.bf16.msra.mxu0 %v3755_v48 }
 0x2d9   : > { %1554 = vrot.lane.b32.xlu1 %v1232_v37, %s3356_s14  ;;  %1552 = vrot.lane.b32.xlu2 %v1227_v40, %s3356_s14 }
 0x2da   : > { %1322 = vmatpush.bf16.msrb.mxu3 %v3748_v39 }
 0x2db   : > { %2711 = vmatmul.msk.bf16.vlgmr.msra.gmra.mxu3 %vm1202_vm0, %v1227_v40  ;;  %1697 = vrot.lane.b32.xlu0 %v1201_v13, %s3357_s13 }
 0x2e1   : > { %1695 = vrot.lane.b32.xlu1 %v1196_v14, %s3357_s13  ;;  %1719 = vrot.lane.b32.xlu2 %v1227_v40, %s3357_s13 }
 0x2e3   : > { %1721 = vrot.lane.b32.xlu0 %v1232_v37, %s3357_s13 }
 0x2eb   : > { %1462 = vrot.lane.b32.xlu0 %v3748_v39, %s3355_s21 }
 0x31b   : > { %v1364_v49 = vpop.permute.xlu2 %1363 }
 0x31c   : > { %v1369_v42 = vsel %vm1202_vm0, %v1364_v49, 0 }
 0x31d   : > { %1378 = vmatpush.bf16.xpose.msrb.mxu1 %v1369_v42 }
 0x323   : > { %v1531_v50 = vpop.permute.xlu2 %1530 }
 0x324   : > { %v1536_v53 = vsel %vm1202_vm0, %v1531_v50, 0 }
 0x325   : > { %1545 = vmatpush.bf16.xpose.msra.mxu1 %v1536_v53 }
 0x32b   : > { %v1529_v52 = vpop.permute.xlu2 %1528 }
 0x333   : > { %v1553_v5 = vpop.permute.xlu2 %1552 }
 0x335   : > { %v1362_v54 = vpop.permute.xlu0 %1361 }
 0x336   : > { %2714 = vmatmul.msk.bf16.vlgmr.msrb.gmra.mxu1 %vm1202_vm0, %v1362_v54 }
 0x33b   : > { %v1720_v9 = vpop.permute.xlu2 %1719 }
 0x343   : > { %v1388_v55 = vpop.permute.xlu1 %1387 }
 0x344   : > { %v1393_v56 = vsel %vm1202_vm0, %v1388_v55, 0 }
 0x345   : > { %1402 = vmatpush.bf16.xpose.msrb.mxu2 %v1393_v56  ;;  %v1386_v57 = vpop.permute.xlu0 %1385 }
 0x346   : > { %v1218_v58 = vpop.f32.mrf.mxu0  ;;  %2718 = vmatmul.msk.bf16.vlgmr.msra.gmra.mxu1 %vm1202_vm0, %v1529_v52 }
 0x347   : > { %v1253_v59 = vsel %vm1202_vm0, %v1218_v58, -inf }
 0x348   : > { %1254 = vmax.xlane.f32.xlu1 %v1253_v59 }
 0x34b   : > { %v1555_v60 = vpop.permute.xlu1 %1554 }
 0x34c   : > { %v1560_v61 = vsel %vm1202_vm0, %v1555_v60, 0  ;;  %2715 = vmatmul.msk.bf16.vlgmr.msrb.gmra.mxu2 %vm1202_vm0, %v1386_v57 }
 0x34d   : > { %1569 = vmatpush.bf16.xpose.msra.mxu2 %v1560_v61  ;;  %v1698_v62 = vpop.permute.xlu0 %1697 }
 0x34e   : > { %v1703_v63 = vsel %vm1202_vm0, %v1698_v62, 0  ;;  %v1220_v0 = vpop.f32.mrf.mxu0 }
 0x34f   : > { %1712 = vmatpush.bf16.xpose.msrb.mxu1 %v1703_v63  ;;  %v1256_v1 = vsel %vm1202_vm0, %v1220_v0, -inf }
 0x350   : > { %1257 = vmax.xlane.f32.xlu0 %v1256_v1 }
 0x353   : > { %v1696_v2 = vpop.permute.xlu1 %1695 }
 0x355   : > { %v1722_v3 = vpop.permute.xlu0 %1721 }
 0x356   : > { %v1727_v4 = vsel %vm1202_vm0, %v1722_v3, 0  ;;  %2722 = vmatmul.msk.bf16.vlgmr.msrb.gmra.mxu1 %vm1202_vm0, %v1696_v2 }
 0x357   : > { %1736 = vmatpush.bf16.xpose.msrb.mxu2 %v1727_v4 }
 0x35c   : > { %2719 = vmatmul.msk.bf16.vlgmr.msra.gmra.mxu2 %vm1202_vm0, %v1553_v5 }
 0x35d   : > { %v1463_v6 = vpop.permute.xlu0 %1462 }
 0x35e   : > { %v1248_v51 = vpop.f32.mrf.mxu3  ;;  %1475 = vmatpush.bf16.msra.mxu3 %v1463_v6 }
 0x35f   : > { %v1259_v41 = vsel %vm1202_vm0, %v1248_v51, -inf }
 0x360   : > { %1260 = vmax.xlane.f32.xlu0 %v1259_v41 }
 0x366   : > { %v1250_v7 = vpop.f32.mrf.mxu3 }
 0x367   : > { %v1262_v8 = vsel %vm1202_vm0, %v1250_v7, -inf }
 0x368   : > { %1263 = vmax.xlane.f32.xlu2 %v1262_v8 }
 0x36c   : > { %2723 = vmatmul.msk.bf16.vlgmr.msrb.gmra.mxu2 %vm1202_vm0, %v1720_v9 }
 0x3b3   : > { %v3783_v10 = vpop.f32.mrf.mxu1 }
 0x3b4   : > { %v1409_v11 = vsel %vm1202_vm0, %v3783_v10, -inf }
 0x3b5   : > { %1410 = vmax.xlane.f32.xlu2 %v1409_v11 }
 0x3bb   : > { %v1255_v12 = vpop.xlane.xlu1 %1254  ;;  %v3787_v13 = vpop.f32.mrf.mxu1 }
 0x3bc   : > { %v1265_v14 = vsub.f32 %v1218_v58, %v1255_v12  ;;  %v1412_v15 = vsel %vm1202_vm0, %v3787_v13, -inf }
 0x3bd   : > { %1413 = vmax.xlane.f32.xlu1 %v1412_v15 }
 0x3be   : > { %v1269_v16 = vmul.f32 1.442695, %v1265_v14 }
 0x3c0   : > { %2972 = vpow2.f32 %v1269_v16 }
 0x3c3   : > { %v1258_v17 = vpop.xlane.xlu0 %1257  ;;  %v3795_v22 = vpop.f32.mrf.mxu1 }
 0x3c4   : > { %v1266_v18 = vsub.f32 %v1220_v0, %v1258_v17  ;;  %v1576_v25 = vsel %vm1202_vm0, %v3795_v22, -inf }
 0x3c6   : > { %v3791_v19 = vpop.eup %2972  ;;  %v1271_v20 = vmul.f32 1.442695, %v1266_v18 }
 0x3c7   : > { %v1277_v21 = vsel %vm1202_vm0, %v3791_v19, 0.0 }
 0x3c8   : > { %2974 = vpow2.f32 %v1271_v20  ;;  %1278 = vadd.xlane.f32.xlu1 %v1277_v21 }
 0x3cb   : > { %v3807_v28 = vpop.f32.mrf.mxu1 }
 0x3cc   : > { %v1579_v33 = vsel %vm1202_vm0, %v3807_v28, -inf }
 0x3ce   : > { %v3797_v23 = vpop.eup %2974 }
 0x3cf   : > { %v3799_v24 = vpop.f32.mrf.mxu2  ;;  %v1280_v26 = vsel %vm1202_vm0, %v3797_v23, 0.0 }
 0x3d0   : > { %1577 = vmax.xlane.f32.xlu1 %v1576_v25  ;;  %1281 = vadd.xlane.f32.xlu0 %v1280_v26  ;;  %v1415_v27 = vsel %vm1202_vm0, %v3799_v24, -inf }
 0x3d1   : > { %1416 = vmax.xlane.f32.xlu2 %v1415_v27 }
 0x3d3   : > { %v1261_v29 = vpop.xlane.xlu0 %1260  ;;  %v3815_v38 = vpop.f32.mrf.mxu1 }
 0x3d4   : > { %v1267_v30 = vsub.f32 %v1248_v51, %v1261_v29  ;;  %v1743_v46 = vsel %vm1202_vm0, %v3815_v38, -inf }
 0x3d6   : > { %v1273_v31 = vmul.f32 1.442695, %v1267_v30 }
 0x3d7   : > { %v3809_v32 = vpop.f32.mrf.mxu2 }
 0x3d8   : > { %2976 = vpow2.f32 %v1273_v31  ;;  %1580 = vmax.xlane.f32.xlu0 %v1579_v33  ;;  %v1418_v34 = vsel %vm1202_vm0, %v3809_v32, -inf }
 0x3d9   : > { %1419 = vmax.xlane.f32.xlu1 %v1418_v34 }
 0x3db   : > { %v1264_v35 = vpop.xlane.xlu2 %1263  ;;  %v3833_v53 = vpop.f32.mrf.mxu1 }
 0x3dc   : > { %v1268_v37 = vsub.f32 %v1250_v7, %v1264_v35  ;;  %v1746_v55 = vsel %vm1202_vm0, %v3833_v53, -inf }
 0x3de   : > { %v3817_v40 = vpop.eup %2976  ;;  %v1275_v43 = vmul.f32 1.442695, %v1268_v37 }
 0x3df   : > { %v1283_v44 = vsel %vm1202_vm0, %v3817_v40, 0.0  ;;  %v3821_v45 = vpop.f32.mrf.mxu2 }
 0x3e0   : > { %2978 = vpow2.f32 %v1275_v43  ;;  %1284 = vadd.xlane.f32.xlu2 %v1283_v44  ;;  %1744 = vmax.xlane.f32.xlu0 %v1743_v46  ;;  %v1582_v42 = vsel %vm1202_vm0, %v3821_v45, -inf }
 0x3e6   : > { %v3825_v47 = vpop.eup %2978 }
 0x3e7   : > { %v1286_v49 = vsel %vm1202_vm0, %v3825_v47, 0.0  ;;  %v3831_v50 = vpop.f32.mrf.mxu2 }
 0x3e8   : > { %1287 = vadd.xlane.f32.xlu1 %v1286_v49  ;;  %1583 = vmax.xlane.f32.xlu2 %v1582_v42  ;;  %v1585_v54 = vsel %vm1202_vm0, %v3831_v50, -inf }
 0x3ef   : > { %v3839_v56 = vpop.f32.mrf.mxu2 }
 0x3f0   : > { %1586 = vmax.xlane.f32.xlu1 %v1585_v54  ;;  %1747 = vmax.xlane.f32.xlu2 %v1746_v55  ;;  %v1749_v52 = vsel %vm1202_vm0, %v3839_v56, -inf }
 0x3f7   : > { %v3843_v57 = vpop.f32.mrf.mxu2 }
 0x3f8   : > { %1750 = vmax.xlane.f32.xlu1 %v1749_v52  ;;  %v1752_v58 = vsel %vm1202_vm0, %v3843_v57, -inf }
 0x3f9   : > { %1753 = vmax.xlane.f32.xlu0 %v1752_v58 }
 0x408   : > { %1629 = vrot.lane.b32.xlu2 %v3748_v39, %s3356_s14 }
 0x411   : > { %1487 = vrot.lane.b32.xlu1 %v3755_v48, %s3355_s21 }
 0x428   : > { %v1411_v59 = vpop.xlane.xlu2 %1410 }
 0x429   : > { %v1421_v60 = vsub.f32 %v3783_v10, %v1411_v59 }
 0x42b   : > { %v1425_v61 = vmul.f32 1.442695, %v1421_v60 }
 0x42d   : > { %2980 = vpow2.f32 %v1425_v61 }
 0x430   : > { %v1414_v62 = vpop.xlane.xlu1 %1413 }
 0x431   : > { %v1422_v63 = vsub.f32 %v3787_v13, %v1414_v62 }
 0x433   : > { %v3853_v0 = vpop.eup %2980  ;;  %v1427_v1 = vmul.f32 1.442695, %v1422_v63 }
 0x434   : > { %v1433_v2 = vsel %vm1202_vm0, %v3853_v0, 0.0 }
 0x435   : > { %2982 = vpow2.f32 %v1427_v1  ;;  %1434 = vadd.xlane.f32.xlu0 %v1433_v2 }
 0x43b   : > { %v3857_v3 = vpop.eup %2982  ;;  %v1279_v4 = vpop.xlane.xlu1 %1278 }
 0x43c   : > { %v1436_v5 = vsel %vm1202_vm0, %v3857_v3, 0.0  ;;  %2984 = vrcp.f32 %v1279_v4 }
 0x43d   : > { %1437 = vadd.xlane.f32.xlu2 %v1436_v5 }
 0x442   : > { %v2985_v41 = vpop.eup %2984 }
 0x443   : > { %v1578_v51 = vpop.xlane.xlu1 %1577  ;;  %v1282_v6 = vpop.xlane.xlu0 %1281  ;;  %v1293_v11 = vmul.f32 %v2985_v41, %v3791_v19 }
 0x444   : > { %v1588_v7 = vsub.f32 %v3795_v22, %v1578_v51  ;;  %2986 = vrcp.f32 %v1282_v6  ;;  %v1417_v8 = vpop.xlane.xlu2 %1416 }
 0x445   : > { %v1423_v10 = vsub.f32 %v3799_v24, %v1417_v8  ;;  %v1297_v14 = vpack.c.bf16 %v1293_v11, %v1293_v11 }
 0x446   : > { %v1592_v9 = vmul.f32 1.442695, %v1588_v7 }
 0x447   : > { %v1429_v13 = vmul.f32 1.442695, %v1423_v10  ;;  %v1303_v24 = vunpack.c.l.b16 %v1297_v14 }
 0x448   : > { %2988 = vpow2.f32 %v1592_v9 }
 0x449   : > { %2990 = vpow2.f32 %v1429_v13 }
 0x44a   : > { %v2987_v12 = vpop.eup %2986 }
 0x44b   : > { %v1294_v15 = vmul.f32 %v2987_v12, %v3797_v23  ;;  %v1581_v16 = vpop.xlane.xlu0 %1580 }
 0x44c   : > { %v1589_v17 = vsub.f32 %v3807_v28, %v1581_v16  ;;  %v1420_v18 = vpop.xlane.xlu1 %1419 }
 0x44d   : > { %v1298_v20 = vpack.c.bf16 %v1294_v15, %v1294_v15  ;;  %v1424_v25 = vsub.f32 %v3809_v32, %v1420_v18 }
 0x44e   : > { %v3866_v21 = vpop.eup %2988  ;;  %v1594_v22 = vmul.f32 1.442695, %v1589_v17 }
 0x44f   : > { %v1304_v26 = vunpack.c.l.b16 %v1298_v20  ;;  %v1600_v19 = vsel %vm1202_vm0, %v3866_v21, 0.0  ;;  %v1431_v23 = vmul.f32 1.442695, %v1424_v25  ;;  %v3872_v30 = vpop.eup %2990 }
 0x450   : > { %2992 = vpow2.f32 %v1594_v22  ;;  %1601 = vadd.xlane.f32.xlu2 %v1600_v19  ;;  %v1439_v34 = vsel %vm1202_vm0, %v3872_v30, 0.0 }
 0x451   : > { %v1305_v27 = vpack.c.b16 %v1304_v26, %v1303_v24 }
 0x453   : > { %v1285_v29 = vpop.xlane.xlu2 %1284  ;;  %2712 = vmatmul.msk.bf16.vlgmr.msrb.gmra.mxu3 %vm1202_vm0, %v1305_v27  ;;  %v1745_v28 = vpop.xlane.xlu0 %1744 }
 0x454   : > { %v1755_v31 = vsub.f32 %v3815_v38, %v1745_v28  ;;  %2994 = vrcp.f32 %v1285_v29 }
 0x455   : > { %2996 = vpow2.f32 %v1431_v23 }
 0x456   : > { %v3875_v33 = vpop.eup %2992  ;;  %v1759_v32 = vmul.f32 1.442695, %v1755_v31 }
 0x457   : > { %v1603_v35 = vsel %vm1202_vm0, %v3875_v33, 0.0 }
 0x458   : > { %2998 = vpow2.f32 %v1759_v32  ;;  %1440 = vadd.xlane.f32.xlu2 %v1439_v34  ;;  %1604 = vadd.xlane.f32.xlu1 %v1603_v35 }
 0x45a   : > { %v2995_v44 = vpop.eup %2994 }
 0x45b   : > { %v1288_v37 = vpop.xlane.xlu1 %1287  ;;  %v1584_v43 = vpop.xlane.xlu2 %1583  ;;  %v1295_v54 = vmul.f32 %v2995_v44, %v3817_v40 }
 0x45c   : > { %3000 = vrcp.f32 %v1288_v37  ;;  %v1590_v38 = vsub.f32 %v3821_v45, %v1584_v43  ;;  %v3882_v46 = vpop.eup %2996 }
 0x45d   : > { %v1442_v55 = vsel %vm1202_vm0, %v3882_v46, 0.0  ;;  %v1299_v59 = vpack.c.bf16 %v1295_v54, %v1295_v54 }
 0x45e   : > { %v1596_v49 = vmul.f32 1.442695, %v1590_v38  ;;  %v3884_v42 = vpop.eup %2998 }
 0x45f   : > { %v1767_v52 = vsel %vm1202_vm0, %v3884_v42, 0.0  ;;  %v1331_v2 = vunpack.c.l.b16 %v1299_v59 }
 0x460   : > { %3002 = vpow2.f32 %v1596_v49  ;;  %1443 = vadd.xlane.f32.xlu1 %v1442_v55  ;;  %1768 = vadd.xlane.f32.xlu0 %v1767_v52 }
 0x462   : > { %v3001_v58 = vpop.eup %3000 }
 0x463   : > { %v1296_v45 = vmul.f32 %v3001_v58, %v3825_v47  ;;  %v1587_v60 = vpop.xlane.xlu1 %1586  ;;  %v1748_v61 = vpop.xlane.xlu2 %1747 }
 0x464   : > { %v1756_v62 = vsub.f32 %v3833_v53, %v1748_v61  ;;  %v1591_v5 = vsub.f32 %v3831_v50, %v1587_v60 }
 0x465   : > { %v1300_v63 = vpack.c.bf16 %v1296_v45, %v1296_v45 }
 0x466   : > { %v3893_v1 = vpop.eup %3002  ;;  %v1761_v40 = vmul.f32 1.442695, %v1756_v62  ;;  %v1598_v41 = vmul.f32 1.442695, %v1591_v5 }
 0x467   : > { %v1332_v4 = vunpack.c.l.b16 %v1300_v63  ;;  %v1606_v51 = vsel %vm1202_vm0, %v3893_v1, 0.0 }
 0x468   : > { %1607 = vadd.xlane.f32.xlu2 %v1606_v51  ;;  %3004 = vpow2.f32 %v1761_v40 }
 0x469   : > { %v1333_v6 = vpack.c.b16 %v1332_v4, %v1331_v2  ;;  %3006 = vpow2.f32 %v1598_v41 }
 0x46b   : > { %v1751_v47 = vpop.xlane.xlu1 %1750  ;;  %2713 = vmatmul.msk.bf16.vlgmr.msra.gmra.mxu0 %vm1202_vm0, %v1333_v6  ;;  %v1630_v7 = vpop.permute.xlu2 %1629 }
 0x46c   : > { %v1757_v53 = vsub.f32 %v3839_v56, %v1751_v47  ;;  %1642 = vmatpush.bf16.msrb.mxu3 %v1630_v7  ;;  %v1754_v14 = vpop.xlane.xlu0 %1753 }
 0x46e   : > { %v1763_v8 = vmul.f32 1.442695, %v1757_v53  ;;  %v3900_v9 = vpop.eup %3004 }
 0x46f   : > { %v1770_v50 = vsel %vm1202_vm0, %v3900_v9, 0.0  ;;  %v3904_v10 = vpop.eup %3006 }
 0x470   : > { %3008 = vpow2.f32 %v1763_v8  ;;  %1771 = vadd.xlane.f32.xlu1 %v1770_v50  ;;  %v1609_v12 = vsel %vm1202_vm0, %v3904_v10, 0.0 }
 0x474   : > { %1796 = vrot.lane.b32.xlu0 %v3748_v39, %s3357_s13  ;;  %v1758_v39 = vsub.f32 %v3843_v57, %v1754_v14 }
 0x476   : > { %v3908_v11 = vpop.eup %3008  ;;  %v1765_v15 = vmul.f32 1.442695, %v1758_v39 }
 0x477   : > { %v1773_v56 = vsel %vm1202_vm0, %v3908_v11, 0.0 }
 0x478   : > { %1774 = vadd.xlane.f32.xlu2 %v1773_v56  ;;  %1610 = vadd.xlane.f32.xlu1 %v1609_v12  ;;  %3010 = vpow2.f32 %v1765_v15 }
 0x47c   : > { %1654 = vrot.lane.b32.xlu0 %v3755_v48, %s3356_s14 }
 0x47e   : > { %v3919_v16 = vpop.eup %3010 }
 0x47f   : > { %v1776_v17 = vsel %vm1202_vm0, %v3919_v16, 0.0 }
 0x483   : > { %v1488_v13 = vpop.permute.xlu1 %1487 }
 0x484   : > { %1500 = vmatpush.bf16.msrb.mxu0 %v1488_v13 }
 0x490   : > { %1821 = vrot.lane.b32.xlu2 %v3755_v48, %s3357_s13 }
 0x4a6   : > { %1777 = vadd.xlane.f32.xlu0 %v1776_v17 }
 0x4a8   : > { %v1435_v18 = vpop.xlane.xlu0 %1434 }
 0x4a9   : > { %3012 = vrcp.f32 %v1435_v18 }
 0x4af   : > { %v3013_v22 = vpop.eup %3012 }
 0x4b0   : > { %v1438_v20 = vpop.xlane.xlu2 %1437  ;;  %v1449_v25 = vmul.f32 %v3013_v22, %v3853_v0 }
 0x4b1   : > { %3014 = vrcp.f32 %v1438_v20 }
 0x4b2   : > { %v1453_v48 = vpack.c.bf16 %v1449_v25, %v1449_v25 }
 0x4b4   : > { %v1459_v19 = vunpack.c.l.b16 %v1453_v48 }
 0x4b7   : > { %v3015_v24 = vpop.eup %3014 }
 0x4b8   : > { %v1450_v26 = vmul.f32 %v3015_v24, %v3857_v3 }
 0x4ba   : > { %v1454_v57 = vpack.c.bf16 %v1450_v26, %v1450_v26 }
 0x4bc   : > { %v1460_v27 = vunpack.c.l.b16 %v1454_v57 }
 0x4be   : > { %v1461_v23 = vpack.c.b16 %v1460_v27, %v1459_v19 }
 0x4c0   : > { %2716 = vmatmul.msk.bf16.vlgmr.msra.gmra.mxu3 %vm1202_vm0, %v1461_v23 }
 0x4c3   : > { %v1602_v29 = vpop.xlane.xlu2 %1601 }
 0x4c4   : > { %3016 = vrcp.f32 %v1602_v29 }
 0x4ca   : > { %v3017_v32 = vpop.eup %3016 }
 0x4cb   : > { %v1441_v28 = vpop.xlane.xlu2 %1440  ;;  %v1605_v31 = vpop.xlane.xlu1 %1604  ;;  %v1616_v34 = vmul.f32 %v3017_v32, %v3866_v21 }
 0x4cc   : > { %3018 = vrcp.f32 %v1605_v31 }
 0x4cd   : > { %3020 = vrcp.f32 %v1441_v28  ;;  %v1620_v43 = vpack.c.bf16 %v1616_v34, %v1616_v34 }
 0x4cf   : > { %v1626_v54 = vunpack.c.l.b16 %v1620_v43 }
 0x4d2   : > { %v3019_v0 = vpop.eup %3018 }
 0x4d3   : > { %v1444_v35 = vpop.xlane.xlu1 %1443  ;;  %v3021_v37 = vpop.eup %3020  ;;  %v1617_v3 = vmul.f32 %v3019_v0, %v3875_v33 }
 0x4d4   : > { %3022 = vrcp.f32 %v1444_v35  ;;  %v1451_v49 = vmul.f32 %v3021_v37, %v3872_v30  ;;  %v1769_v45 = vpop.xlane.xlu0 %1768 }
 0x4d5   : > { %v1621_v44 = vpack.c.bf16 %v1617_v3, %v1617_v3  ;;  %3024 = vrcp.f32 %v1769_v45  ;;  %v2827_v45 = vld [vmem:[%s3675_s29 + $0x8] sm:$0xff] }
 0x4d6   : > { %v1324_v38 = vpop.f32.mrf.mxu3  ;;  %v1455_v59 = vpack.c.bf16 %v1451_v49, %v1451_v49 }
 0x4d7   : > { %1357 = vst.msk [vmem:[#allocation3] sm:$0xff] %vm1202_vm0, %v1324_v38  ;;  %v1627_v55 = vunpack.c.l.b16 %v1621_v44 }
 0x4d8   : > { %v1484_v61 = vunpack.c.l.b16 %v1455_v59 }
 0x4d9   : > { %v1628_v58 = vpack.c.b16 %v1627_v55, %v1626_v54 }
 0x4da   : > { %v3023_v52 = vpop.eup %3022 }
 0x4db   : > { %v1452_v21 = vmul.f32 %v3023_v52, %v3882_v46  ;;  %2720 = vmatmul.msk.bf16.vlgmr.msrb.gmra.mxu3 %vm1202_vm0, %v1628_v58  ;;  %v1608_v63 = vpop.xlane.xlu2 %1607  ;;  %v3025_v2 = vpop.eup %3024  ;;  %v2829_v52 = vld [vmem:[%s3675_s29 + $0x18] sm:$0xff]  ;;  %v2828_v58 = vld [vmem:[%s3675_s29 + $0x10] sm:$0xff] }
 0x4dc   : > { %v1783_v46 = vmul.f32 %v3025_v2, %v3884_v42  ;;  %1910 = vmatpush.bf16.msra.mxu1 %v2829_v52 }
 0x4dd   : > { %v1456_v60 = vpack.c.bf16 %v1452_v21, %v1452_v21 }
 0x4de   : > { %v1326_v33 = vpop.f32.mrf.mxu3  ;;  %v1787_v41 = vpack.c.bf16 %v1783_v46, %v1783_v46 }
 0x4df   : > { %v1485_v62 = vunpack.c.l.b16 %v1456_v60  ;;  %1358 = vst.msk [vmem:[#allocation3 + $0x8] sm:$0xff] %vm1202_vm0, %v1326_v33  ;;  %v2826_v60 = vld [vmem:[%s3675_s29] sm:$0xff] }
 0x4e0   : > { %v1793_v56 = vunpack.c.l.b16 %v1787_v41  ;;  %1911 = vmatpush.bf16.msra.mxu1 %v2828_v58 }
 0x4e1   : > { %v1486_v30 = vpack.c.b16 %v1485_v62, %v1484_v61 }
 0x4e3   : > { %v1772_v40 = vpop.xlane.xlu1 %1771  ;;  %2717 = vmatmul.msk.bf16.vlgmr.msrb.gmra.mxu0 %vm1202_vm0, %v1486_v30 }
 0x4e4   : > { %3026 = vrcp.f32 %v1772_v40  ;;  %1912 = vmatpush.bf16.msra.mxu1 %v2827_v45 }
 0x4e5   : > { %3028 = vrcp.f32 %v1608_v63 }
 0x4e6   : > { %v1797_v4 = vpop.permute.xlu0 %1796 }
 0x4e7   : > { %1809 = vmatpush.bf16.msra.mxu3 %v1797_v4 }
 0x4e8   : > { %v1352_v5 = vpop.f32.mrf.mxu0  ;;  %1913 = vmatpush.bf16.msra.mxu1 %v2826_v60 }
 0x4e9   : > { %1359 = vst.msk [vmem:[#allocation3 + $0x10] sm:$0xff] %vm1202_vm0, %v1352_v5 }
 0x4ea   : > { %v3027_v51 = vpop.eup %3026 }
 0x4eb   : > { %v1775_v6 = vpop.xlane.xlu2 %1774  ;;  %v1784_v47 = vmul.f32 %v3027_v51, %v3900_v9  ;;  %v1611_v7 = vpop.xlane.xlu1 %1610 }
 0x4ec   : > { %v3029_v53 = vpop.eup %3028  ;;  %3030 = vrcp.f32 %v1611_v7 }
 0x4ed   : > { %v1788_v8 = vpack.c.bf16 %v1784_v47, %v1784_v47  ;;  %v1618_v12 = vmul.f32 %v3029_v53, %v3893_v1  ;;  %3032 = vrcp.f32 %v1775_v6  ;;  %v3052_v47 = vld [vmem:[#allocation2] sm:$0xff] }
 0x4ee   : > { %v1655_v50 = vpop.permute.xlu0 %1654 }
 0x4ef   : > { %v1794_v13 = vunpack.c.l.b16 %v1788_v8  ;;  %1667 = vmatpush.bf16.msra.mxu0 %v1655_v50  ;;  %v1622_v17 = vpack.c.bf16 %v1618_v12, %v1618_v12  ;;  %v3053_v50 = vld [vmem:[#allocation2 + $0x8] sm:$0xff] }
 0x4f0   : > { %v1354_v14 = vpop.f32.mrf.mxu0 }
 0x4f1   : > { %1360 = vst.msk [vmem:[#allocation3 + $0x18] sm:$0xff] %vm1202_vm0, %v1354_v14  ;;  %v1795_v42 = vpack.c.b16 %v1794_v13, %v1793_v56  ;;  %v1651_v20 = vunpack.c.l.b16 %v1622_v17  ;;  %v3054_v14 = vld [vmem:[#allocation2 + $0x10] sm:$0xff]  ;;  %v3055_v17 = vld [vmem:[#allocation2 + $0x18] sm:$0xff] }
 0x4f2   : > { %v3031_v39 = vpop.eup %3030 }
 0x4f3   : > { %v1822_v15 = vpop.permute.xlu2 %1821  ;;  %v1619_v18 = vmul.f32 %v3031_v39, %v3904_v10  ;;  %2724 = vmatmul.msk.bf16.vlgmr.msra.gmra.mxu3 %vm1202_vm0, %v1795_v42  ;;  %v3033_v24 = vpop.eup %3032 }
 0x4f4   : > { %1834 = vmatpush.bf16.msrb.mxu0 %v1822_v15  ;;  %v1785_v48 = vmul.f32 %v3033_v24, %v3908_v11 }
 0x4f5   : > { %v1623_v9 = vpack.c.bf16 %v1619_v18, %v1619_v18 }
 0x4f6   : > { %v1789_v57 = vpack.c.bf16 %v1785_v48, %v1785_v48 }
 0x4f7   : > { %v1652_v22 = vunpack.c.l.b16 %v1623_v9 }
 0x4f8   : > { %v1818_v27 = vunpack.c.l.b16 %v1789_v57 }
 0x4f9   : > { %v1653_v25 = vpack.c.b16 %v1652_v22, %v1651_v20 }
 0x4fb   : > { %2721 = vmatmul.msk.bf16.vlgmr.msra.gmra.mxu0 %vm1202_vm0, %v1653_v25 }
 0x519   : > { %v1778_v1 = vpop.xlane.xlu0 %1777 }
 0x51a   : > { %3034 = vrcp.f32 %v1778_v1 }
 0x520   : > { %v3035_v26 = vpop.eup %3034 }
 0x521   : > { %v1786_v19 = vmul.f32 %v3035_v26, %v3919_v16 }
 0x523   : > { %v1790_v10 = vpack.c.bf16 %v1786_v19, %v1786_v19 }
 0x525   : > { %v1819_v23 = vunpack.c.l.b16 %v1790_v10 }
 0x527   : > { %v1820_v29 = vpack.c.b16 %v1819_v23, %v1818_v27 }
 0x529   : > { %2725 = vmatmul.msk.bf16.vlgmr.msrb.gmra.mxu0 %vm1202_vm0, %v1820_v29 }
 0x543   : > { %v1477_v28 = vpop.f32.mrf.mxu3 }
 0x544   : > { %1511 = vrot.lane.b32.xlu1 %v1477_v28, %s3358_s5 }
 0x54b   : > { %v1479_v31 = vpop.f32.mrf.mxu3 }
 0x54c   : > { %1513 = vrot.lane.b32.xlu2 %v1479_v31, %s3358_s5 }
 0x55e   : > { %v1644_v32 = vpop.f32.mrf.mxu3 }
 0x55f   : > { %1678 = vrot.lane.b32.xlu1 %v1644_v32, %s3359_s19 }
 0x560   : > { %v1502_v34 = vpop.f32.mrf.mxu0 }
 0x566   : > { %v1646_v11 = vpop.f32.mrf.mxu3 }
 0x567   : > { %1680 = vrot.lane.b32.xlu2 %v1646_v11, %s3359_s19 }
 0x568   : > { %v1504_v0 = vpop.f32.mrf.mxu0 }
 0x56f   : > { %1515 = vrot.lane.b32.xlu2 %v1502_v34, %s3358_s5 }
 0x576   : > { %v1811_v16 = vpop.f32.mrf.mxu3 }
 0x577   : > { %1845 = vrot.lane.b32.xlu1 %v1811_v16, %s3360_s1 }
 0x578   : > { %v1669_v35 = vpop.f32.mrf.mxu0 }
 0x579   : > { %1682 = vrot.lane.b32.xlu2 %v1669_v35, %s3359_s19  ;;  %v2833_v35 = vld [vmem:[%s3677_s24 + $0x18] sm:$0xff] }
 0x57a   : > { %2081 = vmatpush.bf16.msra.mxu2 %v2833_v35 }
 0x57e   : > { %v1813_v37 = vpop.f32.mrf.mxu3 }
 0x57f   : > { %1517 = vrot.lane.b32.xlu1 %v1504_v0, %s3358_s5  ;;  %1847 = vrot.lane.b32.xlu0 %v1813_v37, %s3360_s1  ;;  %v2832_v37 = vld [vmem:[%s3677_s24 + $0x10] sm:$0xff] }
 0x580   : > { %v1671_v43 = vpop.f32.mrf.mxu0  ;;  %2082 = vmatpush.bf16.msra.mxu2 %v2832_v37 }
 0x587   : > { %1684 = vrot.lane.b32.xlu1 %v1671_v43, %s3359_s19  ;;  %v2831_v43 = vld [vmem:[%s3677_s24 + $0x8] sm:$0xff] }
 0x588   : > { %2083 = vmatpush.bf16.msra.mxu2 %v2831_v43 }
 0x5a6   : > { %v1514_v3 = vpop.permute.xlu2 %1513  ;;  %v1836_v44 = vpop.f32.mrf.mxu0 }
 0x5a7   : > { %1525 = vst.msk [vmem:[#allocation3 + $0x8] sm:$0xff] %vm1523_vm1, %v1514_v3  ;;  %1849 = vrot.lane.b32.xlu2 %v1836_v44, %s3360_s1 }
 0x5ae   : > { %v1838_v38 = vpop.f32.mrf.mxu0 }
 0x5af   : > { %1851 = vrot.lane.b32.xlu0 %v1838_v38, %s3360_s1  ;;  %v2830_v38 = vld [vmem:[%s3677_s24] sm:$0xff] }
 0x5b0   : > { %2084 = vmatpush.bf16.msra.mxu2 %v2830_v38 }
 0x5b6   : > { %v1512_v49 = vpop.permute.xlu1 %1511 }
 0x5b7   : > { %1524 = vst.msk [vmem:[#allocation3] sm:$0xff] %vm1523_vm1, %v1512_v49 }
 0x5c1   : > { %v1681_v54 = vpop.permute.xlu2 %1680 }
 0x5c2   : > { %1692 = vst.msk [vmem:[#allocation3 + $0x8] sm:$0xff] %vm1690_vm3, %v1681_v54 }
 0x5c9   : > { %v1516_v55 = vpop.permute.xlu2 %1515 }
 0x5ca   : > { %1526 = vst.msk [vmem:[#allocation3 + $0x10] sm:$0xff] %vm1523_vm1, %v1516_v55 }
 0x5d1   : > { %v1679_v59 = vpop.permute.xlu1 %1678 }
 0x5d2   : > { %1691 = vst.msk [vmem:[#allocation3] sm:$0xff] %vm1690_vm3, %v1679_v59 }
 0x5d3   : > { %v1683_v21 = vpop.permute.xlu2 %1682 }
 0x5d4   : > { %1693 = vst.msk [vmem:[#allocation3 + $0x10] sm:$0xff] %vm1690_vm3, %v1683_v21 }
 0x5e9   : > { %v1846_v33 = vpop.permute.xlu1 %1845 }
 0x5ea   : > { %1858 = vst.msk [vmem:[#allocation3] sm:$0xff] %vm1857_vm4, %v1846_v33 }
 0x5f1   : > { %v1518_v61 = vpop.permute.xlu1 %1517  ;;  %v1848_v62 = vpop.permute.xlu0 %1847  ;;  %v1862_v63 = vld [vmem:[#allocation3] sm:$0xff] }
 0x5f2   : > { %1527 = vst.msk [vmem:[#allocation3 + $0x18] sm:$0xff] %vm1523_vm1, %v1518_v61 }
 0x5f3   : > { %1859 = vst.msk [vmem:[#allocation3 + $0x8] sm:$0xff] %vm1857_vm4, %v1848_v62 }
 0x5f9   : > { %v1685_v30 = vpop.permute.xlu1 %1684 }
 0x5fa   : > { %1694 = vst.msk [vmem:[#allocation3 + $0x18] sm:$0xff] %vm1690_vm3, %v1685_v30  ;;  %v1863_v40 = vld [vmem:[#allocation3 + $0x8] sm:$0xff] }
 0x5fb   : > { %v1866_v2 = vpack.c.bf16 %v1863_v40, %v1862_v63 }
 0x5fd   : > { %2742 = vmatmul.msk.bf16.vlgmr.msra.gmra.mxu1 %vm905_vm2, %v1866_v2 }
 0x601   : > { %v1850_v4 = vpop.permute.xlu2 %1849 }
 0x602   : > { %1860 = vst.msk [vmem:[#allocation3 + $0x10] sm:$0xff] %vm1857_vm4, %v1850_v4  ;;  %v2958_v4 = vld [vmem:[%s798_s2] ss:$0 sm:$0xff] }
 0x609   : > { %v1864_v5 = vld [vmem:[#allocation3 + $0x10] sm:$0xff] }
 0x621   : > { %v1852_v46 = vpop.permute.xlu0 %1851 }
 0x622   : > { %1861 = vst.msk [vmem:[#allocation3 + $0x18] sm:$0xff] %vm1857_vm4, %v1852_v46 }
 0x629   : > { %v1865_v51 = vld [vmem:[#allocation3 + $0x18] sm:$0xff] }
 0x62a   : > { %v1867_v6 = vpack.c.bf16 %v1865_v51, %v1864_v5 }
 0x62c   : > { %2743 = vmatmul.msk.bf16.gmra.mxu1 %vm905_vm2, %v1867_v6  ;;  %v2959_v6 = vld [vmem:[%s801_s26] ss:$0 sm:$0xff] }
 0x67a   : > { %v1915_v41 = vpop.f32.mrf.mxu1 }
 0x67b   : > { %v3963_v7 = vadd.f32 %v3052_v47, %v1915_v41 }
 0x67d   : > { %v1931_v53 = vsel %vm905_vm2, %v3963_v7, 0.0 }
 0x67e   : > { %1932 = vadd.xlane.f32.xlu1 %v1931_v53 }
 0x682   : > { %v1917_v8 = vpop.f32.mrf.mxu1 }
 0x683   : > { %v3967_v56 = vadd.f32 %v3053_v50, %v1917_v8 }
 0x685   : > { %v1934_v12 = vsel %vm905_vm2, %v3967_v56, 0.0 }
 0x686   : > { %1935 = vadd.xlane.f32.xlu2 %v1934_v12 }
 0x6a9   : > { %v1920_v13 = vpop.f32.mrf.mxu1 }
 0x6aa   : > { %v3971_v42 = vadd.f32 %v3054_v14, %v1920_v13 }
 0x6ac   : > { %v1937_v39 = vsel %vm905_vm2, %v3971_v42, 0.0 }
 0x6ad   : > { %1938 = vadd.xlane.f32.xlu0 %v1937_v39 }
 0x6b1   : > { %v1922_v15 = vpop.f32.mrf.mxu1 }
 0x6b2   : > { %v3975_v18 = vadd.f32 %v3055_v17, %v1922_v15 }
 0x6b4   : > { %v1940_v9 = vsel %vm905_vm2, %v3975_v18, 0.0 }
 0x6b5   : > { %1941 = vadd.xlane.f32.xlu1 %v1940_v9 }
 0x6f1   : > { %v1933_v20 = vpop.xlane.xlu1 %1932 }
 0x6f2   : > { %v1943_v22 = vmul.f32 %v1933_v20, %v3685_v36 }
 0x6f4   : > { %v1947_v25 = vsub.f32 %v3963_v7, %v1943_v22 }
 0x6f6   : > { %v1951_v1 = vmul.f32 %v1947_v25, %v1947_v25 }
 0x6f8   : > { %v1955_v24 = vsel %vm905_vm2, %v1951_v1, 0.0 }
 0x6f9   : > { %1956 = vadd.xlane.f32.xlu2 %v1955_v24  ;;  %v1936_v48 = vpop.xlane.xlu2 %1935 }
 0x6fa   : > { %v1944_v26 = vmul.f32 %v1936_v48, %v3685_v36 }
 0x6fc   : > { %v1948_v57 = vsub.f32 %v3967_v56, %v1944_v26 }
 0x6fe   : > { %v1952_v19 = vmul.f32 %v1948_v57, %v1948_v57 }
 0x700   : > { %v1958_v10 = vsel %vm905_vm2, %v1952_v19, 0.0 }
 0x701   : > { %1959 = vadd.xlane.f32.xlu0 %v1958_v10 }
 0x720   : > { %v1939_v27 = vpop.xlane.xlu0 %1938 }
 0x721   : > { %v1945_v23 = vmul.f32 %v1939_v27, %v3685_v36 }
 0x723   : > { %v3987_v29 = vsub.f32 %v3971_v42, %v1945_v23 }
 0x725   : > { %v1953_v28 = vmul.f32 %v3987_v29, %v3987_v29 }
 0x727   : > { %v1961_v31 = vsel %vm905_vm2, %v1953_v28, 0.0 }
 0x728   : > { %1962 = vadd.xlane.f32.xlu1 %v1961_v31  ;;  %v1942_v32 = vpop.xlane.xlu1 %1941 }
 0x729   : > { %v1946_v34 = vmul.f32 %v1942_v32, %v3685_v36 }
 0x72b   : > { %v3994_v11 = vsub.f32 %v3975_v18, %v1946_v34 }
 0x72d   : > { %v1954_v0 = vmul.f32 %v3994_v11, %v3994_v11 }
 0x72f   : > { %v1964_v16 = vsel %vm905_vm2, %v1954_v0, 0.0 }
 0x730   : > { %1965 = vadd.xlane.f32.xlu2 %v1964_v16 }
 0x76c   : > { %v1957_v3 = vpop.xlane.xlu2 %1956 }
 0x76d   : > { %v1967_v44 = vmul.f32 %v1957_v3, %v3685_v36 }
 0x76f   : > { %v1971_v49 = vadd.f32 1e-05, %v1967_v44  ;;  %v2841_v44 = vld [vmem:[%s3673_s17 + $0x38] sm:$0xff] }
 0x770   : > { %2342 = vmatpush.bf16.msrb.mxu3 %v2841_v44 }
 0x771   : > { %3036 = vrsqrt.f32 %v1971_v49  ;;  %vm1981_vm6 = vweird.f32 %v1971_v49 }
 0x774   : > { %v1960_v54 = vpop.xlane.xlu0 %1959 }
 0x775   : > { %v1968_v55 = vmul.f32 %v1960_v54, %v3685_v36 }
 0x777   : > { %v3037_v52 = vpop.eup %3036  ;;  %v1972_v58 = vadd.f32 1e-05, %v1968_v55 }
 0x778   : > { %v1976_v59 = vmul.f32 %v3037_v52, %v1971_v49  ;;  %vm1982_vm5 = vweird.f32 %v3037_v52  ;;  %v2840_v49 = vld [vmem:[%s3673_s17 + $0x30] sm:$0xff] }
 0x779   : > { %3038 = vrsqrt.f32 %v1972_v58  ;;  %vm1983_vm7 = vmor %vm1981_vm6, %vm1982_vm5  ;;  %vm1991_vm9 = vweird.f32 %v1972_v58  ;;  %2343 = vmatpush.bf16.msrb.mxu3 %v2840_v49 }
 0x77a   : > { %v1977_v21 = vmul.f32 %v3037_v52, %v1976_v59 }
 0x77c   : > { %v1978_v45 = vmul.f32 0.5, %v1977_v21  ;;  %v2839_v21 = vld [vmem:[%s3673_s17 + $0x28] sm:$0xff] }
 0x77d   : > { %2344 = vmatpush.bf16.msrb.mxu3 %v2839_v21 }
 0x77e   : > { %v1979_v60 = vsub.f32 1.5, %v1978_v45 }
 0x77f   : > { %v3039_v33 = vpop.eup %3038 }
 0x780   : > { %v1980_v61 = vmul.f32 %v3037_v52, %v1979_v60  ;;  %v1986_v62 = vmul.f32 %v3039_v33, %v1972_v58  ;;  %vm1992_vm8 = vweird.f32 %v3039_v33 }
 0x781   : > { %vm1993_vm10 = vmor %vm1991_vm9, %vm1992_vm8 }
 0x782   : > { %v1987_v30 = vmul.f32 %v3039_v33, %v1986_v62  ;;  %v1984_v63 = vsel %vm1983_vm7, %v3037_v52, %v1980_v61  ;;  %v2838_v62 = vld [vmem:[%s3673_s17 + $0x20] sm:$0xff] }
 0x783   : > { %v2015_v46 = vmul.f32 %v1984_v63, %v1947_v25  ;;  %2345 = vmatpush.bf16.msrb.mxu3 %v2838_v62 }
 0x784   : > { %v1988_v40 = vmul.f32 0.5, %v1987_v30 }
 0x785   : > { %v2022_v41 = vmul.f32 %v2958_v4, %v2015_v46  ;;  %v2837_v46 = vld [vmem:[%s3673_s17 + $0x18] sm:$0xff] }
 0x786   : > { %v1989_v2 = vsub.f32 1.5, %v1988_v40 }
 0x787   : > { %v2029_v8 = vadd.f32 %v2959_v6, %v2022_v41  ;;  %2346 = vmatpush.bf16.msrb.mxu3 %v2837_v46 }
 0x788   : > { %v1990_v5 = vmul.f32 %v3039_v33, %v1989_v2 }
 0x78a   : > { %v1994_v51 = vsel %vm1993_vm10, %v3039_v33, %v1990_v5 }
 0x78b   : > { %v2016_v47 = vmul.f32 %v1994_v51, %v1948_v57 }
 0x78d   : > { %v2023_v53 = vmul.f32 %v2958_v4, %v2016_v47 }
 0x78f   : > { %v2030_v50 = vadd.f32 %v2959_v6, %v2023_v53 }
 0x791   : > { %v2033_v12 = vpack.c.bf16 %v2030_v50, %v2029_v8  ;;  %v2836_v50 = vld [vmem:[%s3673_s17 + $0x10] sm:$0xff] }
 0x792   : > { %2347 = vmatpush.bf16.msrb.mxu3 %v2836_v50 }
 0x793   : > { %2760 = vmatmul.msk.bf16.vlgmr.msra.gmra.mxu2 %vm905_vm2, %v2033_v12 }
 0x79b   : > { %v1963_v13 = vpop.xlane.xlu1 %1962 }
 0x79c   : > { %v1969_v14 = vmul.f32 %v1963_v13, %v3685_v36 }
 0x79e   : > { %v1973_v39 = vadd.f32 1e-05, %v1969_v14 }
 0x7a0   : > { %3040 = vrsqrt.f32 %v1973_v39  ;;  %vm2001_vm12 = vweird.f32 %v1973_v39 }
 0x7a3   : > { %v1966_v15 = vpop.xlane.xlu2 %1965 }
 0x7a4   : > { %v1970_v17 = vmul.f32 %v1966_v15, %v3685_v36 }
 0x7a6   : > { %v3041_v9 = vpop.eup %3040  ;;  %v1974_v20 = vadd.f32 1e-05, %v1970_v17 }
 0x7a7   : > { %v1996_v22 = vmul.f32 %v3041_v9, %v1973_v39  ;;  %vm2002_vm11 = vweird.f32 %v3041_v9 }
 0x7a8   : > { %3042 = vrsqrt.f32 %v1974_v20  ;;  %vm2003_vm13 = vmor %vm2001_vm12, %vm2002_vm11  ;;  %vm2011_vm15 = vweird.f32 %v1974_v20 }
 0x7a9   : > { %v1997_v25 = vmul.f32 %v3041_v9, %v1996_v22 }
 0x7ab   : > { %v1998_v1 = vmul.f32 0.5, %v1997_v25 }
 0x7ad   : > { %v1999_v24 = vsub.f32 1.5, %v1998_v1 }
 0x7ae   : > { %v3043_v48 = vpop.eup %3042 }
 0x7af   : > { %v2000_v26 = vmul.f32 %v3041_v9, %v1999_v24  ;;  %v2006_v57 = vmul.f32 %v3043_v48, %v1974_v20  ;;  %vm2012_vm14 = vweird.f32 %v3043_v48  ;;  %v2835_v20 = vld [vmem:[%s3673_s17 + $0x8] sm:$0xff] }
 0x7b0   : > { %vm2013_vm0 = vmor %vm2011_vm15, %vm2012_vm14  ;;  %2348 = vmatpush.bf16.msrb.mxu3 %v2835_v20 }
 0x7b1   : > { %v2007_v19 = vmul.f32 %v3043_v48, %v2006_v57  ;;  %v2004_v10 = vsel %vm2003_vm13, %v3041_v9, %v2000_v26  ;;  %v2834_v26 = vld [vmem:[%s3673_s17] sm:$0xff] }
 0x7b2   : > { %v2017_v36 = vmul.f32 %v2004_v10, %v3987_v29  ;;  %v4026_v29 = vld [vmem:[%s804_s6] ss:$0 sm:$0xff] }
 0x7b3   : > { %v2008_v27 = vmul.f32 0.5, %v2007_v19 }
 0x7b4   : > { %v2024_v34 = vmul.f32 %v2958_v4, %v2017_v36  ;;  %2349 = vmatpush.bf16.msrb.mxu3 %v2834_v26 }
 0x7b5   : > { %v2009_v23 = vsub.f32 1.5, %v2008_v27 }
 0x7b6   : > { %v2031_v16 = vadd.f32 %v2959_v6, %v2024_v34 }
 0x7b7   : > { %v2010_v28 = vmul.f32 %v3043_v48, %v2009_v23 }
 0x7b9   : > { %v2014_v31 = vsel %vm2013_vm0, %v3043_v48, %v2010_v28 }
 0x7ba   : > { %v2018_v32 = vmul.f32 %v2014_v31, %v3994_v11 }
 0x7bc   : > { %v2025_v0 = vmul.f32 %v2958_v4, %v2018_v32 }
 0x7be   : > { %v2032_v35 = vadd.f32 %v2959_v6, %v2025_v0 }
 0x7c0   : > { %v2034_v37 = vpack.c.bf16 %v2032_v35, %v2031_v16 }
 0x7c2   : > { %2761 = vmatmul.msk.bf16.gmra.mxu2 %vm905_vm2, %v2034_v37 }
 0x816   : > { %v2086_v43 = vpop.f32.mrf.mxu2 }
 0x817   : > { %v4029_v3 = vadd.f32 %v4026_v29, %v2086_v43 }
 0x819   : > { %v4033_v11 = vmul.f32 0.70710677, %v4029_v3 }
 0x81b   : > { %v2104_v38 = vmul.f32 %v4033_v11, %v4033_v11 }
 0x81d   : > { %v2105_v54 = vmin.f32 %v2104_v38, 16.0 }
 0x81e   : > { %v2088_v55 = vpop.f32.mrf.mxu2 }
 0x81f   : > { %v2106_v52 = vmul.f32 2.1237322e-06, %v2105_v54  ;;  %v2117_v58 = vmul.f32 3.8918573e-05, %v2105_v54  ;;  %v4039_v59 = vadd.f32 %v4026_v29, %v2088_v55 }
 0x821   : > { %v2107_v45 = vadd.f32 0.00028619796, %v2106_v52  ;;  %v2118_v60 = vadd.f32 0.001143296, %v2117_v58  ;;  %v4043_v33 = vmul.f32 0.70710677, %v4039_v59 }
 0x823   : > { %v2119_v61 = vmul.f32 %v2118_v60, %v2105_v54  ;;  %v2144_v30 = vmul.f32 %v4043_v33, %v4043_v33  ;;  %v2108_v63 = vmul.f32 %v2107_v45, %v2105_v54 }
 0x825   : > { %v2120_v40 = vadd.f32 0.014752088, %v2119_v61  ;;  %v2145_v2 = vmin.f32 %v2144_v30, 16.0  ;;  %v2109_v6 = vadd.f32 0.0036580483, %v2108_v63 }
 0x827   : > { %v2121_v4 = vmul.f32 %v2120_v40, %v2105_v54  ;;  %v2146_v5 = vmul.f32 2.1237322e-06, %v2145_v2  ;;  %v2157_v51 = vmul.f32 3.8918573e-05, %v2145_v2  ;;  %v2110_v14 = vmul.f32 %v2109_v6, %v2105_v54 }
 0x829   : > { %v2122_v41 = vadd.f32 0.112945676, %v2121_v4  ;;  %v2147_v47 = vadd.f32 0.00028619796, %v2146_v5  ;;  %v2158_v53 = vadd.f32 0.001143296, %v2157_v51 }
 0x82a   : > { %v2111_v25 = vadd.f32 0.05243302, %v2110_v14 }
 0x82b   : > { %v2123_v8 = vmul.f32 %v2122_v41, %v2105_v54  ;;  %v2148_v12 = vmul.f32 %v2147_v47, %v2145_v2  ;;  %v2159_v13 = vmul.f32 %v2158_v53, %v2145_v2 }
 0x82c   : > { %v2112_v19 = vmul.f32 %v2111_v25, %v2105_v54  ;;  %v2096_v25 = vmul.f32 0.5, %v4029_v3 }
 0x82d   : > { %v2124_v39 = vadd.f32 0.4994258, %v2123_v8  ;;  %v2149_v15 = vadd.f32 0.0036580483, %v2148_v12  ;;  %v2160_v17 = vadd.f32 0.014752088, %v2159_v13 }
 0x82e   : > { %v2113_v28 = vadd.f32 0.18741608, %v2112_v19 }
 0x82f   : > { %v2125_v9 = vmul.f32 %v2124_v39, %v2105_v54  ;;  %v2161_v22 = vmul.f32 %v2160_v17, %v2145_v2  ;;  %v2150_v24 = vmul.f32 %v2149_v15, %v2145_v2 }
 0x830   : > { %v2114_v16 = vmul.f32 %v2113_v28, %v2105_v54 }
 0x831   : > { %v2126_v1 = vadd.f32 1.0, %v2125_v9  ;;  %v2162_v48 = vadd.f32 0.112945676, %v2161_v22  ;;  %v2151_v10 = vadd.f32 0.05243302, %v2150_v24 }
 0x832   : > { %v2115_v49 = vadd.f32 1.1283791, %v2114_v16 }
 0x833   : > { %3044 = vrcp.f32 %v2126_v1  ;;  %v2163_v57 = vmul.f32 %v2162_v48, %v2145_v2  ;;  %v2152_v32 = vmul.f32 %v2151_v10, %v2145_v2  ;;  %v2138_v37 = vand.u32 2147483648, %v2126_v1 }
 0x834   : > { %v2136_v44 = vand.u32 2147483647, %v2126_v1  ;;  %vm2132_vm3 = vweird.f32 %v2126_v1  ;;  %v2116_v61 = vmul.f32 %v2115_v49, %v4033_v11 }
 0x835   : > { %v2164_v27 = vadd.f32 0.4994258, %v2163_v57  ;;  %v2153_v43 = vadd.f32 0.18741608, %v2152_v32  ;;  %v2139_v58 = vor.u32 1.1754944e-38, %v2138_v37 }
 0x836   : > { %vm2137_vm5 = vcmp.eq.f32.partialorder %v2136_v44, 8.507059e+37 }
 0x837   : > { %v2165_v23 = vmul.f32 %v2164_v27, %v2145_v2  ;;  %v2154_v21 = vmul.f32 %v2153_v43, %v2145_v2 }
 0x839   : > { %v3045_v36 = vpop.eup %3044  ;;  %v2166_v34 = vadd.f32 1.0, %v2165_v23  ;;  %v2155_v30 = vadd.f32 1.1283791, %v2154_v21 }
 0x83a   : > { %v2128_v31 = vmul.f32 %v3045_v36, %v2126_v1  ;;  %vm2133_vm1 = vweird.f32 %v3045_v36 }
 0x83b   : > { %3046 = vrcp.f32 %v2166_v34  ;;  %vm2134_vm4 = vmor %vm2132_vm3, %vm2133_vm1  ;;  %v2178_v63 = vand.u32 2147483648, %v2166_v34  ;;  %v2176_v5 = vand.u32 2147483647, %v2166_v34  ;;  %vm2172_vm7 = vweird.f32 %v2166_v34 }
 0x83c   : > { %v2129_v0 = vsub.f32 1.0, %v2128_v31  ;;  %v2156_v47 = vmul.f32 %v2155_v30, %v4043_v33  ;;  %v2097_v33 = vmul.f32 0.5, %v4039_v59 }
 0x83d   : > { %v2179_v6 = vor.u32 1.1754944e-38, %v2178_v63  ;;  %vm2177_vm9 = vcmp.eq.f32.partialorder %v2176_v5, 8.507059e+37 }
 0x83e   : > { %v2130_v35 = vmul.f32 %v3045_v36, %v2129_v0 }
 0x840   : > { %v2131_v38 = vadd.f32 %v3045_v36, %v2130_v35 }
 0x841   : > { %v3047_v55 = vpop.eup %3046 }
 0x842   : > { %v2135_v52 = vsel %vm2134_vm4, %v3045_v36, %v2131_v38  ;;  %v2168_v45 = vmul.f32 %v3047_v55, %v2166_v34  ;;  %vm2173_vm6 = vweird.f32 %v3047_v55 }
 0x843   : > { %v2140_v60 = vsel %vm2137_vm5, %v2139_v58, %v2135_v52  ;;  %vm2174_vm8 = vmor %vm2172_vm7, %vm2173_vm6 }
 0x844   : > { %v2169_v62 = vsub.f32 1.0, %v2168_v45  ;;  %v2141_v4 = vmul.f32 %v2140_v60, %v2116_v61 }
 0x845   : > { %v2091_v54 = vpop.f32.mrf.mxu2 }
 0x846   : > { %v4054_v40 = vadd.f32 %v4026_v29, %v2091_v54  ;;  %v2170_v46 = vmul.f32 %v3047_v55, %v2169_v62  ;;  %v2762_v41 = vclamps-f32 %v2141_v4, 1.0 }
 0x848   : > { %v4057_v51 = vmul.f32 0.70710677, %v4054_v40  ;;  %v2171_v2 = vadd.f32 %v3047_v55, %v2170_v46  ;;  %v2264_v17 = vadd.f32 1.0, %v2762_v41 }
 0x84a   : > { %v2184_v11 = vmul.f32 %v4057_v51, %v4057_v51  ;;  %v2175_v53 = vsel %vm2174_vm8, %v3047_v55, %v2171_v2  ;;  %v2268_v26 = vmul.f32 %v2264_v17, %v2096_v25 }
 0x84b   : > { %v2180_v8 = vsel %vm2177_vm9, %v2179_v6, %v2175_v53 }
 0x84c   : > { %v2185_v50 = vmin.f32 %v2184_v11, 16.0  ;;  %v2181_v12 = vmul.f32 %v2180_v8, %v2156_v47 }
 0x84d   : > { %v2093_v13 = vpop.f32.mrf.mxu2 }
 0x84e   : > { %v2186_v14 = vmul.f32 2.1237322e-06, %v2185_v50  ;;  %v4063_v39 = vadd.f32 %v4026_v29, %v2093_v13  ;;  %v2197_v15 = vmul.f32 3.8918573e-05, %v2185_v50  ;;  %v2763_v9 = vclamps-f32 %v2181_v12, 1.0 }
 0x850   : > { %v2187_v20 = vadd.f32 0.00028619796, %v2186_v14  ;;  %v4066_v22 = vmul.f32 0.70710677, %v4063_v39  ;;  %v2265_v1 = vadd.f32 1.0, %v2763_v9 }
 0x851   : > { %v2198_v24 = vadd.f32 0.001143296, %v2197_v15 }
 0x852   : > { %v2224_v48 = vmul.f32 %v4066_v22, %v4066_v22  ;;  %v2269_v57 = vmul.f32 %v2265_v1, %v2097_v33  ;;  %v2188_v29 = vmul.f32 %v2187_v20, %v2185_v50 }
 0x853   : > { %v2199_v19 = vmul.f32 %v2198_v24, %v2185_v50 }
 0x854   : > { %v2225_v10 = vmin.f32 %v2224_v48, 16.0  ;;  %v2272_v27 = vpack.c.bf16 %v2269_v57, %v2268_v26  ;;  %v2189_v31 = vadd.f32 0.0036580483, %v2188_v29 }
 0x855   : > { %v2200_v23 = vadd.f32 0.014752088, %v2199_v19 }
 0x856   : > { %v2226_v36 = vmul.f32 2.1237322e-06, %v2225_v10  ;;  %v2237_v28 = vmul.f32 3.8918573e-05, %v2225_v10  ;;  %2350 = vmatmul.bf16.vlgmr.msrb.gmra.mxu3 %v2272_v27  ;;  %v2190_v35 = vmul.f32 %v2189_v31, %v2185_v50 }
 0x857   : > { %v2201_v32 = vmul.f32 %v2200_v23, %v2185_v50 }
 0x858   : > { %v2227_v3 = vadd.f32 0.00028619796, %v2226_v36  ;;  %v2238_v34 = vadd.f32 0.001143296, %v2237_v28  ;;  %v2191_v55 = vadd.f32 0.05243302, %v2190_v35 }
 0x859   : > { %v2202_v59 = vadd.f32 0.112945676, %v2201_v32  ;;  %v2098_v32 = vmul.f32 0.5, %v4054_v40 }
 0x85a   : > { %v2228_v0 = vmul.f32 %v2227_v3, %v2225_v10  ;;  %v2239_v16 = vmul.f32 %v2238_v34, %v2225_v10  ;;  %v2192_v61 = vmul.f32 %v2191_v55, %v2185_v50  ;;  %v2099_v3 = vmul.f32 0.5, %v4063_v39 }
 0x85b   : > { %v2203_v37 = vmul.f32 %v2202_v59, %v2185_v50 }
 0x85c   : > { %v2229_v43 = vadd.f32 0.0036580483, %v2228_v0  ;;  %v2240_v44 = vadd.f32 0.014752088, %v2239_v16  ;;  %v2193_v63 = vadd.f32 0.18741608, %v2192_v61 }
 0x85d   : > { %v2204_v38 = vadd.f32 0.4994258, %v2203_v37 }
 0x85e   : > { %v2241_v49 = vmul.f32 %v2240_v44, %v2225_v10  ;;  %v2230_v58 = vmul.f32 %v2229_v43, %v2225_v10  ;;  %v2194_v6 = vmul.f32 %v2193_v63, %v2185_v50 }
 0x85f   : > { %v2205_v52 = vmul.f32 %v2204_v38, %v2185_v50 }
 0x860   : > { %v2242_v21 = vadd.f32 0.112945676, %v2241_v49  ;;  %v2231_v62 = vadd.f32 0.05243302, %v2230_v58  ;;  %v2195_v12 = vadd.f32 1.1283791, %v2194_v6 }
 0x861   : > { %v2206_v45 = vadd.f32 1.0, %v2205_v52 }
 0x862   : > { %v2243_v60 = vmul.f32 %v2242_v21, %v2225_v10  ;;  %v2232_v4 = vmul.f32 %v2231_v62, %v2225_v10  ;;  %v2196_v25 = vmul.f32 %v2195_v12, %v4057_v51 }
 0x863   : > { %3048 = vrcp.f32 %v2206_v45  ;;  %v2218_v47 = vand.u32 2147483648, %v2206_v45  ;;  %v2216_v8 = vand.u32 2147483647, %v2206_v45  ;;  %vm2212_vm11 = vweird.f32 %v2206_v45 }
 0x864   : > { %v2244_v54 = vadd.f32 0.4994258, %v2243_v60  ;;  %v2233_v11 = vadd.f32 0.18741608, %v2232_v4 }
 0x865   : > { %v2219_v17 = vor.u32 1.1754944e-38, %v2218_v47  ;;  %vm2217_vm13 = vcmp.eq.f32.partialorder %v2216_v8, 8.507059e+37 }
 0x866   : > { %v2245_v30 = vmul.f32 %v2244_v54, %v2225_v10  ;;  %v2234_v14 = vmul.f32 %v2233_v11, %v2225_v10 }
 0x868   : > { %v2246_v46 = vadd.f32 1.0, %v2245_v30  ;;  %v2235_v1 = vadd.f32 1.1283791, %v2234_v14 }
 0x869   : > { %v3049_v5 = vpop.eup %3048 }
 0x86a   : > { %v2208_v2 = vmul.f32 %v3049_v5, %v2206_v45  ;;  %3050 = vrcp.f32 %v2246_v46  ;;  %vm2213_vm10 = vweird.f32 %v3049_v5  ;;  %v2258_v24 = vand.u32 2147483648, %v2246_v46 }
 0x86b   : > { %vm2214_vm12 = vmor %vm2212_vm11, %vm2213_vm10  ;;  %v2256_v57 = vand.u32 2147483647, %v2246_v46  ;;  %vm2252_vm15 = vweird.f32 %v2246_v46  ;;  %v2236_v10 = vmul.f32 %v2235_v1, %v4066_v22  ;;  %v2961_v22 = vld [vmem:[%s812_s12] ss:$0 sm:$0xff] }
 0x86c   : > { %v2209_v41 = vsub.f32 1.0, %v2208_v2  ;;  %v2259_v19 = vor.u32 1.1754944e-38, %v2258_v24 }
 0x86d   : > { %vm2257_vm1 = vcmp.eq.f32.partialorder %v2256_v57, 8.507059e+37 }
 0x86e   : > { %v2210_v53 = vmul.f32 %v3049_v5, %v2209_v41 }
 0x870   : > { %v3051_v13 = vpop.eup %3050  ;;  %v2211_v15 = vadd.f32 %v3049_v5, %v2210_v53 }
 0x871   : > { %v2248_v9 = vmul.f32 %v3051_v13, %v2246_v46  ;;  %vm2253_vm14 = vweird.f32 %v3051_v13 }
 0x872   : > { %v2215_v20 = vsel %vm2214_vm12, %v3049_v5, %v2211_v15  ;;  %vm2254_vm0 = vmor %vm2252_vm15, %vm2253_vm14 }
 0x873   : > { %v2220_v33 = vsel %vm2217_vm13, %v2219_v17, %v2215_v20  ;;  %v2249_v50 = vsub.f32 1.0, %v2248_v9 }
 0x874   : > { %v2221_v48 = vmul.f32 %v2220_v33, %v2196_v25 }
 0x875   : > { %v2250_v26 = vmul.f32 %v3051_v13, %v2249_v50 }
 0x876   : > { %v2764_v27 = vclamps-f32 %v2221_v48, 1.0 }
 0x877   : > { %v2251_v29 = vadd.f32 %v3051_v13, %v2250_v26 }
 0x878   : > { %v2266_v31 = vadd.f32 1.0, %v2764_v27 }
 0x879   : > { %v2255_v23 = vsel %vm2254_vm0, %v3051_v13, %v2251_v29 }
 0x87a   : > { %v2260_v36 = vsel %vm2257_vm1, %v2259_v19, %v2255_v23  ;;  %v2270_v59 = vmul.f32 %v2266_v31, %v2098_v32 }
 0x87b   : > { %v2261_v51 = vmul.f32 %v2260_v36, %v2236_v10 }
 0x87d   : > { %v2765_v28 = vclamps-f32 %v2261_v51, 1.0 }
 0x87f   : > { %v2267_v34 = vadd.f32 1.0, %v2765_v28 }
 0x881   : > { %v2271_v0 = vmul.f32 %v2267_v34, %v2099_v3 }
 0x883   : > { %v2273_v16 = vpack.c.bf16 %v2271_v0, %v2270_v59 }
 0x885   : > { %2355 = vmatmul.bf16.gmra.mxu3 %v2273_v16 }
 0x8d9   : > { %v2351_v35 = vpop.f32.mrf.mxu3 }
 0x8da   : > { %v2352_v37 = vadd.f32 %v2961_v22, %v2351_v35 }
 0x8dc   : > { %v2361_v43 = vadd.f32 %v2352_v37, %v3963_v7 }
 0x8de   : > { %2365 = vst.msk [vmem:[#allocation2] sm:$0xff] %vm905_vm2, %v2361_v43 }
 0x8e1   : > { %v2353_v44 = vpop.f32.mrf.mxu3 }
 0x8e2   : > { %v2354_v40 = vadd.f32 %v2961_v22, %v2353_v44 }
 0x8e4   : > { %v2362_v39 = vadd.f32 %v2354_v40, %v3967_v56 }
 0x8e6   : > { %2366 = vst.msk [vmem:[#allocation2 + $0x8] sm:$0xff] %vm905_vm2, %v2362_v39 }
 0x908   : > { %v2356_v38 = vpop.f32.mrf.mxu3 }
 0x909   : > { %v2357_v49 = vadd.f32 %v2961_v22, %v2356_v38 }
 0x90b   : > { %v2363_v55 = vadd.f32 %v2357_v49, %v3971_v42 }
 0x90d   : > { %2367 = vst.msk [vmem:[#allocation2 + $0x10] sm:$0xff] %vm905_vm2, %v2363_v55 }
 0x910   : > { %v2358_v52 = vpop.f32.mrf.mxu3 }
 0x911   : > { %v2359_v58 = vadd.f32 %v2961_v22, %v2358_v52  ;;  %2372 = sbr.rel (%p2798_p1) target bundleno = 2330 (0x91a), region = 120 }
 0x913   : > { %v2364_v21 = vadd.f32 %v2359_v58, %v3975_v18 }
 0x915   : > { %2368 = vst.msk [vmem:[#allocation2 + $0x18] sm:$0xff] %vm905_vm2, %v2364_v21 }
 0x916   : > { %2373 = vst.msk [vmem:[#allocation15] sm:$0xff] %vm905_vm2, %v2361_v43 }
 0x917   : > { %2374 = vst.msk [vmem:[#allocation15 + $0x8] sm:$0xff] %vm905_vm2, %v2362_v39 }
 0x918   : > { %2375 = vst.msk [vmem:[#allocation15 + $0x10] sm:$0xff] %vm905_vm2, %v2363_v55 }
 0x919   : > { %2376 = vst.msk [vmem:[#allocation15 + $0x18] sm:$0xff] %vm905_vm2, %v2364_v21 }
 0x91a PF: > { %p2903_p4 = scmp.eq.s32.totalorder %s3468_s25, 1  ;;  %s3361_s12 = smov [#allocation15]  }
 0x91b   : > { %s2382_s28 = sshll.u32 %s3361_s12, 4  ;;  %s4183_s29 = sld [smem:[#allocation39_spill]]  ;;  %s2383_s28 = int_to_ptr.vmem [resolvable:$true] %s2382_s28 }
 0x91c   : > { %s3362_s3 = smov 128   ;;  %s3363_s9 = smov 8  }
 0x921   : > { %s2384_s24 = sshll.u32 %s4183_s29, 4  ;;  %s2385_s24 = int_to_ptr.hbm [resolvable:$true] %s2384_s24 }
 0x922   : > { %2868 = dma.vmem_to_hbm [thread:$0]  (%p2903_p4), %s2383_s28, 512, %s2385_s24, [#allocation6], %s3362_s3, %s3362_s3, %s3363_s9  }
 0x923   : > { %3327 = dma.done.wait (%p2903_p4), [#allocation6], 512  }
 0x924   : > { %3329 = vsyncadd (%p2903_p4), [#allocation6], 4294966784 }
 0x925 PF: > { %s4184_s30 = sld [smem:[#allocation21_spill]]  ;;  %p27_p5 = scmp.ge.s32.totalorder %s3497_s20, 4  }
 0x926   : > { %s4185_s23 = sld [smem:[#allocation22_spill]]  ;;  %s4186_s21 = smov %s3336_s22 }
 0x927   : > { %s4188_s24 = smov %s3497_s20  ;;  %29 = sbr.rel (!%p27_p5) target bundleno = 22 (0x16), region = 193 }
 0x92b   : > { %s4187_s22 = smov %s4184_s30 }
 0x92c   :  { %2401 = vsyncpa [#allocation5], 1 }
 0x92d   :  { %2403 = vsyncpa [#allocation5 + $0x1], 1 }
 0x92e   :  { %2404 = vsyncpa [#allocation8], 1 }
 0x92f   :  { %2405 = vsyncpa [#allocation11], 1 }
 0x930   :  { %2406 = vsyncpa [#allocation6], 1 }
 0x931   :  { %2408 = vsyncpa [#allocation6 + $0x1], 1 }

</bundles_post_ra>
